<compile_context>
chip_gen: v7x
topology: tpu7x:2x2x1
jax: 0.10.0
libtpu: 0.0.40
codegen_flags: <defaults>
</compile_context>

<pallas_src>
import jax
import jax.numpy as jnp
from jax import lax
from jax.experimental import pallas as pl
from jax.experimental.pallas import tpu as pltpu


# --------------------------- kernel ----------------------------------------------

def _sigmoid(x):
    # One EUP push (tanh) instead of exp + reciprocal.
    return 0.5 * (jnp.tanh(0.5 * x) + 1.0)


def _make_kernel(H, Tc, T_total, n_t, last_row, needs_mask, unroll):
    H4 = 4 * H

    def kernel(x_ref, wih_f_ref, whh_f_ref, b_f_ref,
               wih_b_ref, b_b_ref, fc_w_ref, fc_b_ref,
               out_ref, h_scr, c_scr):
        TB = x_ref.shape[-1]
        t_blk = pl.program_id(1)

        @pl.when(t_blk == 0)
        def _init():
            h_scr[...] = jnp.zeros_like(h_scr)
            c_scr[...] = jnp.zeros_like(c_scr)

        # Hoisted loads / broadcasts (JAX does not CSE broadcast_in_dim inside loops).
        wih = wih_f_ref[...]                                    # (4H, E)
        whh = whh_f_ref[...]                                    # (4H, H)
        bias = jnp.broadcast_to(b_f_ref[...], (H4, TB)).astype(jnp.float32)

        def gate_step(gates, c):
            # Packed gate order (i, f, o, g): one sigmoid over 3H rows, one tanh over H.
            sig = _sigmoid(gates[:3 * H])
            g = jnp.tanh(gates[3 * H:])
            i = sig[:H]
            f = sig[H:2 * H]
            o = sig[2 * H:3 * H]
            c_new = f * c + i * g
            h_new = o * jnp.tanh(c_new)
            return h_new, c_new

        def body(t, carry):
            h, c = carry
            x_t = x_ref[t]                                      # (E, TB)
            gates = (jnp.dot(wih, x_t, preferred_element_type=jnp.float32)
                     + jnp.dot(whh, h.astype(whh.dtype),
                               preferred_element_type=jnp.float32)
                     + bias)                                    # (4H, TB) f32
            h_new, c_new = gate_step(gates, c)
            if needs_mask:
                valid = (t_blk * Tc + t) < T_total              # freeze padded steps
                h_new = jnp.where(valid, h_new, h)
                c_new = jnp.where(valid, c_new, c)
            return h_new, c_new

        h, c = lax.fori_loop(0, Tc, body, (h_scr[...], c_scr[...]), unroll=unroll)
        h_scr[...] = h
        c_scr[...] = c

        @pl.when(t_blk == n_t - 1)
        def _finalize():
            # Backward direction at original time T-1 == first step of the reversed
            # scan from zero state on x[T-1]; h0 == 0 so the whh_b term vanishes.
            # TODO(synk): only valid because the module consumes lstm_out[:, -1, :]
            # with lengths=None; do not reuse this kernel for variable-length inputs.
            gb = (jnp.dot(wih_b_ref[...], x_ref[last_row],
                          preferred_element_type=jnp.float32)
                  + jnp.broadcast_to(b_b_ref[...], (H4, TB)).astype(jnp.float32))
            h_bwd, _ = gate_step(gb, jnp.zeros((H, TB), jnp.float32))

            hidden = jnp.concatenate([h, h_bwd], axis=0)        # (2H, TB)
            logits = (jnp.dot(fc_w_ref[...], hidden,
                              preferred_element_type=jnp.float32)
                      + fc_b_ref[...])                          # (1, TB), lane-dense
            out_ref[...] = _sigmoid(logits)

    return kernel


# --------------------------- VMEM accounting --------------------------------------

def _padded_vmem_bytes(shape, dtype):
    """Bytes a VMEM block of `shape` actually occupies (sublane/lane padding aware)."""
    itemsize = jnp.dtype(dtype).itemsize
    sub_mult = {4: 8, 2: 16, 1: 32}.get(itemsize, 8)
    dims = list(shape) if len(shape) >= 2 else [1] + list(shape)
    *lead, s, l = dims
    n = 1
    for d in lead:
        n *= int(d)
    s_p = -(-int(s) // sub_mult) * sub_mult
    l_p = -(-int(l) // 128) * 128
    return n * s_p * l_p * itemsize


def _vmem_capacity_bytes():
    try:
        return int(pltpu.get_tpu_info().vmem_capacity_bytes)
    except Exception:
        return 64 << 20          # v7x worst case; v5e/v6e have 128 MiB


def _choose_time_chunk(T, E, TB, x_dtype, budget_bytes, cap=256):
    per_step = _padded_vmem_bytes((1, E, TB), x_dtype)
    max_tc = max(1, budget_bytes // (2 * per_step))   # 2 = double-buffered x block
    return int(min(T, cap, max_tc))


# --------------------------- wrapper -----------------------------------------------

def lstm_capsule_forward(token_ids, params, compute_dtype=jnp.float32):
    """compute_dtype controls MXU input dtype for x / wih / whh (bf16 on v6e/v7x);
    carries, gate math and accumulation stay f32."""
    emb = params["embedding"]
    B, T = token_ids.shape
    E = emb.shape[1]
    H = params["whh_f"].shape[0] // 4          # whh_f is (4H, H)

    # ---- batch tiling: batch lives on the 128-lane axis inside the kernel ----
    if B <= 128:
        Bp = -(-B // 8) * 8
        TB = Bp                                # single tile: any lane extent allowed
    else:
        Bp = -(-B // 128) * 128
        TB = 128                               # >=2 tiles -> megacore 'parallel' axis
    n_b = Bp // TB

    # ---- time chunk sized from the PADDED footprint and the chip's VMEM ----
    cap_bytes = _vmem_capacity_bytes()
    Tc = _choose_time_chunk(T, E, TB, compute_dtype, budget_bytes=int(cap_bytes * 0.4))
    n_t = -(-T // Tc)
    Tp = n_t * Tc
    needs_mask = (Tp != T)
    last_row = (T - 1) - (n_t - 1) * Tc        # static row of x[T-1] in the last block

    # Pad batch (token 0 -> zero embedding row, discarded) and time (masked in-kernel).
    if Bp != B or Tp != T:
        token_ids = jnp.pad(token_ids, ((0, Bp - B), (0, Tp - T)))

    # Embedding gather (plain-JAX glue) + cheap layout transpose to (T, E, B):
    # batch on lanes removes the E<128 lane-padding blow-up inside the kernel.
    x = jnp.take(emb, token_ids, axis=0).astype(compute_dtype)   # (Bp, Tp, E)
    x = jnp.transpose(x, (1, 2, 0))                               # (Tp, E, Bp)

    wih_f = params["wih_f"].astype(compute_dtype)
    whh_f = params["whh_f"].astype(compute_dtype)
    wih_b = params["wih_b"].astype(compute_dtype)

    kernel = _make_kernel(H, Tc, T, n_t, last_row, needs_mask, unroll=min(8, Tc))

    # Explicit scoped-VMEM limit from padded block/scratch sizes (+ double buffering).
    x_blk = _padded_vmem_bytes((Tc, E, TB), compute_dtype)
    w_bytes = (_padded_vmem_bytes((4 * H, E), compute_dtype) * 2   # wih_f, wih_b
               + _padded_vmem_bytes((4 * H, H), compute_dtype)     # whh_f
               + _padded_vmem_bytes((4 * H, 1), jnp.float32) * 2   # biases
               + _padded_vmem_bytes((1, 2 * H), jnp.float32)
               + _padded_vmem_bytes((1, 1), jnp.float32))
    scratch_bytes = 2 * _padded_vmem_bytes((H, TB), jnp.float32)
    out_bytes = _padded_vmem_bytes((1, TB), jnp.float32)
    total = 2 * (x_blk + w_bytes + out_bytes) + scratch_bytes
    vmem_limit = int(min(max(total + (4 << 20), 32 << 20), int(cap_bytes * 0.9)))

    out = pl.pallas_call(
        kernel,
        out_shape=jax.ShapeDtypeStruct((1, Bp), jnp.float32),
        grid_spec=pltpu.PrefetchScalarGridSpec(
            num_scalar_prefetch=0,
            grid=(n_b, n_t),
            in_specs=[
                pl.BlockSpec((Tc, E, TB), lambda b, t: (t, 0, b)),   # x, streamed over T
                pl.BlockSpec((4 * H, E), lambda b, t: (0, 0)),       # wih_f
                pl.BlockSpec((4 * H, H), lambda b, t: (0, 0)),       # whh_f
                pl.BlockSpec((4 * H, 1), lambda b, t: (0, 0)),       # b_f
                pl.BlockSpec((4 * H, E), lambda b, t: (0, 0)),       # wih_b
                pl.BlockSpec((4 * H, 1), lambda b, t: (0, 0)),       # b_b
                pl.BlockSpec((1, 2 * H), lambda b, t: (0, 0)),       # fc_w
                pl.BlockSpec((1, 1), lambda b, t: (0, 0)),           # fc_b
            ],
            out_specs=pl.BlockSpec((1, TB), lambda b, t: (0, b)),     # lane-dense output
            scratch_shapes=[
                pltpu.VMEM((H, TB), jnp.float32),    # h carried across time blocks
                pltpu.VMEM((H, TB), jnp.float32),    # c carried across time blocks
            ],
        ),
        compiler_params=pltpu.CompilerParams(
            dimension_semantics=("parallel", "arbitrary"),
            vmem_limit_bytes=vmem_limit),
    )(x, wih_f, whh_f, params["b_f"], wih_b, params["b_b"],
      params["fc_w"], params["fc_b"])
    return out[0, :B]                                                # (B,)


# --------------------------- parameters -----------------------------------------

def init_raw_params(key, vocab_size=100, embedding_dim=8, hidden_dim=16):
    """PyTorch-layout parameters (gate order i, f, g, o; separate ih/hh biases)."""
    ks = jax.random.split(key, 11)
    bound = 1.0 / (hidden_dim ** 0.5)

    def u(k, shape):
        return jax.random.uniform(k, shape, jnp.float32, -bound, bound)

    emb = jax.random.normal(ks[0], (vocab_size, embedding_dim), jnp.float32)
    emb = emb.at[0].set(0.0)                                     # padding_idx=0

    return dict(
        embedding=emb,
        w_ih_f=u(ks[1], (4 * hidden_dim, embedding_dim)),
        w_hh_f=u(ks[2], (4 * hidden_dim, hidden_dim)),
        b_ih_f=u(ks[3], (4 * hidden_dim,)),
        b_hh_f=u(ks[4], (4 * hidden_dim,)),
        w_ih_b=u(ks[5], (4 * hidden_dim, embedding_dim)),
        w_hh_b=u(ks[6], (4 * hidden_dim, hidden_dim)),
        b_ih_b=u(ks[7], (4 * hidden_dim,)),
        b_hh_b=u(ks[8], (4 * hidden_dim,)),
        fc_w=u(ks[9], (1, 2 * hidden_dim)),
        fc_b=u(ks[10], (1,)),
    )


def prepare_kernel_params(raw):
    """Keep PyTorch (4H, K) weight layout (batch-on-lanes kernel uses it directly);
    fuse biases and reorder gates (i,f,g,o) -> (i,f,o,g) along the 4H axis."""
    H = raw["w_hh_f"].shape[1]

    def reorder(w):
        return jnp.concatenate([w[:2 * H], w[3 * H:4 * H], w[2 * H:3 * H]], axis=0)

    def pack_b(b_ih, b_hh):
        return reorder(b_ih + b_hh)[:, None]          # (4H, 1)

    return dict(
        embedding=raw["embedding"],
        wih_f=reorder(raw["w_ih_f"]),                 # (4H, E)
        whh_f=reorder(raw["w_hh_f"]),                 # (4H, H)
        b_f=pack_b(raw["b_ih_f"], raw["b_hh_f"]),
        wih_b=reorder(raw["w_ih_b"]),
        b_b=pack_b(raw["b_ih_b"], raw["b_hh_b"]),
        # w_hh_b intentionally dropped: backward output at t=T-1 starts from zero state.
        fc_w=raw["fc_w"],                             # (1, 2H)
        fc_b=raw["fc_b"][None, :],                    # (1, 1)
    )


# --------------------------- reference & test ------------------------------------

def _reference_forward(token_ids, raw):
    """Pure-JAX reference using the raw PyTorch-layout weights (gate order i,f,g,o)."""
    x = jnp.take(raw["embedding"], token_ids, axis=0)            # (B, T, E)
    B, T, _ = x.shape
    H = raw["w_hh_f"].shape[1]

    def step(x_t, h, c, w_ih, w_hh, b_ih, b_hh):
        g = x_t @ w_ih.T + h @ w_hh.T + b_ih + b_hh
        i = jax.nn.sigmoid(g[:, :H])
        f = jax.nn.sigmoid(g[:, H:2 * H])
        gg = jnp.tanh(g[:, 2 * H:3 * H])
        o = jax.nn.sigmoid(g[:, 3 * H:])
        c = f * c + i * gg
        return o * jnp.tanh(c), c

    h = jnp.zeros((B, H)); c = jnp.zeros((B, H))
    for t in range(T):
        h, c = step(x[:, t], h, c, raw["w_ih_f"], raw["w_hh_f"],
                    raw["b_ih_f"], raw["b_hh_f"])
    hb, _ = step(x[:, T - 1], jnp.zeros((B, H)), jnp.zeros((B, H)),
                 raw["w_ih_b"], raw["w_hh_b"], raw["b_ih_b"], raw["b_hh_b"])
    last = jnp.concatenate([h, hb], axis=-1)
    return jax.nn.sigmoid(last @ raw["fc_w"].T + raw["fc_b"])[:, 0]


if __name__ == "__main__":
    key = jax.random.PRNGKey(0)
    k_params, k_tokens = jax.random.split(key)

    vocab_size, embedding_dim, hidden_dim = 100, 8, 16
    batch, seq_len = 2, 8

    raw = init_raw_params(k_params, vocab_size, embedding_dim, hidden_dim)
    params = prepare_kernel_params(raw)
    token_ids = jax.random.randint(k_tokens, (batch, seq_len), 0, vocab_size,
                                   dtype=jnp.int32)

    ref = _reference_forward(token_ids, raw)

    # f32 path (strict check, also the v5e default).
    preds = jax.block_until_ready(lstm_capsule_forward(token_ids, params))
    assert preds.shape == (batch,)
    assert jnp.allclose(preds, ref, atol=1e-4), (preds, ref)

    # bf16 MXU-input path (v6e/v7x): x + packed weights in bf16, carries / gate math
    # and accumulation in f32 -> small, bounded rounding vs. the f32 reference.
    preds_bf16 = jax.block_until_ready(
        lstm_capsule_forward(token_ids, params, compute_dtype=jnp.bfloat16))
    assert jnp.allclose(preds_bf16, ref, atol=1e-2), (preds_bf16, ref)

    print("KERNEL_OK")
</pallas_src>

<mosaic_0001>
module attributes {stable_mosaic.version = 11 : i64} {
  func.func @kernel(%arg0: i32, %arg1: i32, %arg2: memref<8x8x8xf32, #tpu.memory_space<vmem>>, %arg3: memref<64x8xf32, #tpu.memory_space<vmem>>, %arg4: memref<64x16xf32, #tpu.memory_space<vmem>>, %arg5: memref<64x1xf32, #tpu.memory_space<vmem>>, %arg6: memref<64x8xf32, #tpu.memory_space<vmem>>, %arg7: memref<64x1xf32, #tpu.memory_space<vmem>>, %arg8: memref<1x32xf32, #tpu.memory_space<vmem>>, %arg9: memref<1x1xf32, #tpu.memory_space<vmem>>, %arg10: memref<1x8xf32, #tpu.memory_space<vmem>>, %arg11: memref<16x8xf32, #tpu.memory_space<vmem>>, %arg12: memref<16x8xf32, #tpu.memory_space<vmem>>) attributes {dimension_semantics = [#tpu.dimension_semantics<parallel>, #tpu.dimension_semantics<arbitrary>], iteration_bounds = array<i64: 1, 1>, scalar_prefetch = 0 : i64, scratch_operands = 2 : i64, tpu.core_type = #tpu.core_type<tc>, window_params = [{transform_indices = @transform_0, window_bounds = array<i64: 8, 8, 8>}, {pipeline_mode = #tpu.pipeline_mode<synchronous>, transform_indices = @transform_1, window_bounds = array<i64: 64, 8>}, {pipeline_mode = #tpu.pipeline_mode<synchronous>, transform_indices = @transform_2, window_bounds = array<i64: 64, 16>}, {pipeline_mode = #tpu.pipeline_mode<synchronous>, transform_indices = @transform_3, window_bounds = array<i64: 64, 1>}, {pipeline_mode = #tpu.pipeline_mode<synchronous>, transform_indices = @transform_4, window_bounds = array<i64: 64, 8>}, {pipeline_mode = #tpu.pipeline_mode<synchronous>, transform_indices = @transform_5, window_bounds = array<i64: 64, 1>}, {pipeline_mode = #tpu.pipeline_mode<synchronous>, transform_indices = @transform_6, window_bounds = array<i64: 1, 32>}, {pipeline_mode = #tpu.pipeline_mode<synchronous>, transform_indices = @transform_7, window_bounds = array<i64: 1, 1>}, {transform_indices = @transform_8, window_bounds = array<i64: 1, 8>}]} {
    %c0_i32 = arith.constant 0 : i32
    %0 = arith.cmpi eq, %arg1, %c0_i32 : i32
    %1 = arith.extui %0 : i1 to i32
    %c0_i32_0 = arith.constant 0 : i32
    %2 = arith.cmpi ne, %1, %c0_i32_0 : i32
    scf.if %2 {
      %cst_72 = arith.constant 0.000000e+00 : f32
      %215 = vector.broadcast %cst_72 : f32 to vector<16x8xf32>
      %c0_73 = arith.constant 0 : index
      %c0_74 = arith.constant 0 : index
      %216 = vector.load %arg11[%c0_73, %c0_74] : memref<16x8xf32, #tpu.memory_space<vmem>>, vector<16x8xf32>
      tpu.vector_store %arg11[%c0_73, %c0_74], %215 {strides = array<i32>} : memref<16x8xf32, #tpu.memory_space<vmem>>, vector<16x8xf32>,
      %cst_75 = arith.constant 0.000000e+00 : f32
      %217 = vector.broadcast %cst_75 : f32 to vector<16x8xf32>
      %c0_76 = arith.constant 0 : index
      %c0_77 = arith.constant 0 : index
      %218 = vector.load %arg12[%c0_76, %c0_77] : memref<16x8xf32, #tpu.memory_space<vmem>>, vector<16x8xf32>
      tpu.vector_store %arg12[%c0_76, %c0_77], %217 {strides = array<i32>} : memref<16x8xf32, #tpu.memory_space<vmem>>, vector<16x8xf32>,
    } else {
    }
    %c0 = arith.constant 0 : index
    %c0_1 = arith.constant 0 : index
    %3 = vector.load %arg3[%c0, %c0_1] : memref<64x8xf32, #tpu.memory_space<vmem>>, vector<64x8xf32>
    %c0_2 = arith.constant 0 : index
    %c0_3 = arith.constant 0 : index
    %4 = vector.load %arg4[%c0_2, %c0_3] : memref<64x16xf32, #tpu.memory_space<vmem>>, vector<64x16xf32>
    %c0_4 = arith.constant 0 : index
    %c0_5 = arith.constant 0 : index
    %5 = vector.load %arg5[%c0_4, %c0_5] : memref<64x1xf32, #tpu.memory_space<vmem>>, vector<64x1xf32>
    %6 = vector.shape_cast %5 : vector<64x1xf32> to vector<64x1xf32>
    %7 = vector.broadcast %6 : vector<64x1xf32> to vector<64x8xf32>
    %c0_6 = arith.constant 0 : index
    %c0_7 = arith.constant 0 : index
    %8 = vector.load %arg11[%c0_6, %c0_7] : memref<16x8xf32, #tpu.memory_space<vmem>>, vector<16x8xf32>
    %c0_8 = arith.constant 0 : index
    %c0_9 = arith.constant 0 : index
    %9 = vector.load %arg12[%c0_8, %c0_9] : memref<16x8xf32, #tpu.memory_space<vmem>>, vector<16x8xf32>
    %c0_i32_10 = arith.constant 0 : i32
    %10 = arith.index_cast %c0_i32_10 : i32 to index
    %c0_11 = arith.constant 0 : index
    %c0_12 = arith.constant 0 : index
    %11 = vector.load %arg2[%10, %c0_11, %c0_12] : memref<8x8x8xf32, #tpu.memory_space<vmem>>, vector<1x8x8xf32>
    %12 = vector.shape_cast %11 : vector<1x8x8xf32> to vector<8x8xf32>
    %cst = arith.constant dense<0.000000e+00> : vector<64x8xf32>
    %13 = tpu.matmul %3, %12, %cst {dimension_numbers = #tpu.dot_dimension_numbers<[1], [0], [0], [1], [0, 0, 1, 1], [], []>} : vector<64x8xf32>, vector<8x8xf32>, vector<64x8xf32> -> vector<64x8xf32>
    %cst_13 = arith.constant dense<0.000000e+00> : vector<64x8xf32>
    %14 = tpu.matmul %4, %8, %cst_13 {dimension_numbers = #tpu.dot_dimension_numbers<[1], [0], [0], [1], [0, 0, 1, 1], [], []>} : vector<64x16xf32>, vector<16x8xf32>, vector<64x8xf32> -> vector<64x8xf32>
    %15 = arith.addf %13, %14 : vector<64x8xf32>
    %16 = arith.addf %15, %7 : vector<64x8xf32>
    %17 = vector.extract_strided_slice %16 {offsets = [0, 0], sizes = [48, 8], strides = [1, 1]} : vector<64x8xf32> to vector<48x8xf32>
    %cst_14 = arith.constant 5.000000e-01 : f32
    %18 = vector.broadcast %cst_14 : f32 to vector<48x8xf32>
    %19 = arith.mulf %18, %17 : vector<48x8xf32>
    %20 = math.tanh %19 : vector<48x8xf32>
    %cst_15 = arith.constant 1.000000e+00 : f32
    %21 = vector.broadcast %cst_15 : f32 to vector<48x8xf32>
    %22 = arith.addf %20, %21 : vector<48x8xf32>
    %cst_16 = arith.constant 5.000000e-01 : f32
    %23 = vector.broadcast %cst_16 : f32 to vector<48x8xf32>
    %24 = arith.mulf %23, %22 : vector<48x8xf32>
    %25 = vector.extract_strided_slice %16 {offsets = [48, 0], sizes = [16, 8], strides = [1, 1]} : vector<64x8xf32> to vector<16x8xf32>
    %26 = math.tanh %25 : vector<16x8xf32>
    %27 = vector.extract_strided_slice %24 {offsets = [0, 0], sizes = [16, 8], strides = [1, 1]} : vector<48x8xf32> to vector<16x8xf32>
    %28 = vector.extract_strided_slice %24 {offsets = [16, 0], sizes = [16, 8], strides = [1, 1]} : vector<48x8xf32> to vector<16x8xf32>
    %29 = vector.extract_strided_slice %24 {offsets = [32, 0], sizes = [16, 8], strides = [1, 1]} : vector<48x8xf32> to vector<16x8xf32>
    %30 = arith.mulf %28, %9 : vector<16x8xf32>
    %31 = arith.mulf %27, %26 : vector<16x8xf32>
    %32 = arith.addf %30, %31 : vector<16x8xf32>
    %33 = math.tanh %32 : vector<16x8xf32>
    %34 = arith.mulf %29, %33 : vector<16x8xf32>
    %c1_i32 = arith.constant 1 : i32
    %35 = arith.index_cast %c1_i32 : i32 to index
    %c0_17 = arith.constant 0 : index
    %c0_18 = arith.constant 0 : index
    %36 = vector.load %arg2[%35, %c0_17, %c0_18] : memref<8x8x8xf32, #tpu.memory_space<vmem>>, vector<1x8x8xf32>
    %37 = vector.shape_cast %36 : vector<1x8x8xf32> to vector<8x8xf32>
    %cst_19 = arith.constant dense<0.000000e+00> : vector<64x8xf32>
    %38 = tpu.matmul %3, %37, %cst_19 {dimension_numbers = #tpu.dot_dimension_numbers<[1], [0], [0], [1], [0, 0, 1, 1], [], []>} : vector<64x8xf32>, vector<8x8xf32>, vector<64x8xf32> -> vector<64x8xf32>
    %cst_20 = arith.constant dense<0.000000e+00> : vector<64x8xf32>
    %39 = tpu.matmul %4, %34, %cst_20 {dimension_numbers = #tpu.dot_dimension_numbers<[1], [0], [0], [1], [0, 0, 1, 1], [], []>} : vector<64x16xf32>, vector<16x8xf32>, vector<64x8xf32> -> vector<64x8xf32>
    %40 = arith.addf %38, %39 : vector<64x8xf32>
    %41 = arith.addf %40, %7 : vector<64x8xf32>
    %42 = vector.extract_strided_slice %41 {offsets = [0, 0], sizes = [48, 8], strides = [1, 1]} : vector<64x8xf32> to vector<48x8xf32>
    %cst_21 = arith.constant 5.000000e-01 : f32
    %43 = vector.broadcast %cst_21 : f32 to vector<48x8xf32>
    %44 = arith.mulf %43, %42 : vector<48x8xf32>
    %45 = math.tanh %44 : vector<48x8xf32>
    %cst_22 = arith.constant 1.000000e+00 : f32
    %46 = vector.broadcast %cst_22 : f32 to vector<48x8xf32>
    %47 = arith.addf %45, %46 : vector<48x8xf32>
    %cst_23 = arith.constant 5.000000e-01 : f32
    %48 = vector.broadcast %cst_23 : f32 to vector<48x8xf32>
    %49 = arith.mulf %48, %47 : vector<48x8xf32>
    %50 = vector.extract_strided_slice %41 {offsets = [48, 0], sizes = [16, 8], strides = [1, 1]} : vector<64x8xf32> to vector<16x8xf32>
    %51 = math.tanh %50 : vector<16x8xf32>
    %52 = vector.extract_strided_slice %49 {offsets = [0, 0], sizes = [16, 8], strides = [1, 1]} : vector<48x8xf32> to vector<16x8xf32>
    %53 = vector.extract_strided_slice %49 {offsets = [16, 0], sizes = [16, 8], strides = [1, 1]} : vector<48x8xf32> to vector<16x8xf32>
    %54 = vector.extract_strided_slice %49 {offsets = [32, 0], sizes = [16, 8], strides = [1, 1]} : vector<48x8xf32> to vector<16x8xf32>
    %55 = arith.mulf %53, %32 : vector<16x8xf32>
    %56 = arith.mulf %52, %51 : vector<16x8xf32>
    %57 = arith.addf %55, %56 : vector<16x8xf32>
    %58 = math.tanh %57 : vector<16x8xf32>
    %59 = arith.mulf %54, %58 : vector<16x8xf32>
    %c2_i32 = arith.constant 2 : i32
    %60 = arith.index_cast %c2_i32 : i32 to index
    %c0_24 = arith.constant 0 : index
    %c0_25 = arith.constant 0 : index
    %61 = vector.load %arg2[%60, %c0_24, %c0_25] : memref<8x8x8xf32, #tpu.memory_space<vmem>>, vector<1x8x8xf32>
    %62 = vector.shape_cast %61 : vector<1x8x8xf32> to vector<8x8xf32>
    %cst_26 = arith.constant dense<0.000000e+00> : vector<64x8xf32>
    %63 = tpu.matmul %3, %62, %cst_26 {dimension_numbers = #tpu.dot_dimension_numbers<[1], [0], [0], [1], [0, 0, 1, 1], [], []>} : vector<64x8xf32>, vector<8x8xf32>, vector<64x8xf32> -> vector<64x8xf32>
    %cst_27 = arith.constant dense<0.000000e+00> : vector<64x8xf32>
    %64 = tpu.matmul %4, %59, %cst_27 {dimension_numbers = #tpu.dot_dimension_numbers<[1], [0], [0], [1], [0, 0, 1, 1], [], []>} : vector<64x16xf32>, vector<16x8xf32>, vector<64x8xf32> -> vector<64x8xf32>
    %65 = arith.addf %63, %64 : vector<64x8xf32>
    %66 = arith.addf %65, %7 : vector<64x8xf32>
    %67 = vector.extract_strided_slice %66 {offsets = [0, 0], sizes = [48, 8], strides = [1, 1]} : vector<64x8xf32> to vector<48x8xf32>
    %cst_28 = arith.constant 5.000000e-01 : f32
    %68 = vector.broadcast %cst_28 : f32 to vector<48x8xf32>
    %69 = arith.mulf %68, %67 : vector<48x8xf32>
    %70 = math.tanh %69 : vector<48x8xf32>
    %cst_29 = arith.constant 1.000000e+00 : f32
    %71 = vector.broadcast %cst_29 : f32 to vector<48x8xf32>
    %72 = arith.addf %70, %71 : vector<48x8xf32>
    %cst_30 = arith.constant 5.000000e-01 : f32
    %73 = vector.broadcast %cst_30 : f32 to vector<48x8xf32>
    %74 = arith.mulf %73, %72 : vector<48x8xf32>
    %75 = vector.extract_strided_slice %66 {offsets = [48, 0], sizes = [16, 8], strides = [1, 1]} : vector<64x8xf32> to vector<16x8xf32>
    %76 = math.tanh %75 : vector<16x8xf32>
    %77 = vector.extract_strided_slice %74 {offsets = [0, 0], sizes = [16, 8], strides = [1, 1]} : vector<48x8xf32> to vector<16x8xf32>
    %78 = vector.extract_strided_slice %74 {offsets = [16, 0], sizes = [16, 8], strides = [1, 1]} : vector<48x8xf32> to vector<16x8xf32>
    %79 = vector.extract_strided_slice %74 {offsets = [32, 0], sizes = [16, 8], strides = [1, 1]} : vector<48x8xf32> to vector<16x8xf32>
    %80 = arith.mulf %78, %57 : vector<16x8xf32>
    %81 = arith.mulf %77, %76 : vector<16x8xf32>
    %82 = arith.addf %80, %81 : vector<16x8xf32>
    %83 = math.tanh %82 : vector<16x8xf32>
    %84 = arith.mulf %79, %83 : vector<16x8xf32>
    %c3_i32 = arith.constant 3 : i32
    %85 = arith.index_cast %c3_i32 : i32 to index
    %c0_31 = arith.constant 0 : index
    %c0_32 = arith.constant 0 : index
    %86 = vector.load %arg2[%85, %c0_31, %c0_32] : memref<8x8x8xf32, #tpu.memory_space<vmem>>, vector<1x8x8xf32>
    %87 = vector.shape_cast %86 : vector<1x8x8xf32> to vector<8x8xf32>
    %cst_33 = arith.constant dense<0.000000e+00> : vector<64x8xf32>
    %88 = tpu.matmul %3, %87, %cst_33 {dimension_numbers = #tpu.dot_dimension_numbers<[1], [0], [0], [1], [0, 0, 1, 1], [], []>} : vector<64x8xf32>, vector<8x8xf32>, vector<64x8xf32> -> vector<64x8xf32>
    %cst_34 = arith.constant dense<0.000000e+00> : vector<64x8xf32>
    %89 = tpu.matmul %4, %84, %cst_34 {dimension_numbers = #tpu.dot_dimension_numbers<[1], [0], [0], [1], [0, 0, 1, 1], [], []>} : vector<64x16xf32>, vector<16x8xf32>, vector<64x8xf32> -> vector<64x8xf32>
    %90 = arith.addf %88, %89 : vector<64x8xf32>
    %91 = arith.addf %90, %7 : vector<64x8xf32>
    %92 = vector.extract_strided_slice %91 {offsets = [0, 0], sizes = [48, 8], strides = [1, 1]} : vector<64x8xf32> to vector<48x8xf32>
    %cst_35 = arith.constant 5.000000e-01 : f32
    %93 = vector.broadcast %cst_35 : f32 to vector<48x8xf32>
    %94 = arith.mulf %93, %92 : vector<48x8xf32>
    %95 = math.tanh %94 : vector<48x8xf32>
    %cst_36 = arith.constant 1.000000e+00 : f32
    %96 = vector.broadcast %cst_36 : f32 to vector<48x8xf32>
    %97 = arith.addf %95, %96 : vector<48x8xf32>
    %cst_37 = arith.constant 5.000000e-01 : f32
    %98 = vector.broadcast %cst_37 : f32 to vector<48x8xf32>
    %99 = arith.mulf %98, %97 : vector<48x8xf32>
    %100 = vector.extract_strided_slice %91 {offsets = [48, 0], sizes = [16, 8], strides = [1, 1]} : vector<64x8xf32> to vector<16x8xf32>
    %101 = math.tanh %100 : vector<16x8xf32>
    %102 = vector.extract_strided_slice %99 {offsets = [0, 0], sizes = [16, 8], strides = [1, 1]} : vector<48x8xf32> to vector<16x8xf32>
    %103 = vector.extract_strided_slice %99 {offsets = [16, 0], sizes = [16, 8], strides = [1, 1]} : vector<48x8xf32> to vector<16x8xf32>
    %104 = vector.extract_strided_slice %99 {offsets = [32, 0], sizes = [16, 8], strides = [1, 1]} : vector<48x8xf32> to vector<16x8xf32>
    %105 = arith.mulf %103, %82 : vector<16x8xf32>
    %106 = arith.mulf %102, %101 : vector<16x8xf32>
    %107 = arith.addf %105, %106 : vector<16x8xf32>
    %108 = math.tanh %107 : vector<16x8xf32>
    %109 = arith.mulf %104, %108 : vector<16x8xf32>
    %c4_i32 = arith.constant 4 : i32
    %110 = arith.index_cast %c4_i32 : i32 to index
    %c0_38 = arith.constant 0 : index
    %c0_39 = arith.constant 0 : index
    %111 = vector.load %arg2[%110, %c0_38, %c0_39] : memref<8x8x8xf32, #tpu.memory_space<vmem>>, vector<1x8x8xf32>
    %112 = vector.shape_cast %111 : vector<1x8x8xf32> to vector<8x8xf32>
    %cst_40 = arith.constant dense<0.000000e+00> : vector<64x8xf32>
    %113 = tpu.matmul %3, %112, %cst_40 {dimension_numbers = #tpu.dot_dimension_numbers<[1], [0], [0], [1], [0, 0, 1, 1], [], []>} : vector<64x8xf32>, vector<8x8xf32>, vector<64x8xf32> -> vector<64x8xf32>
    %cst_41 = arith.constant dense<0.000000e+00> : vector<64x8xf32>
    %114 = tpu.matmul %4, %109, %cst_41 {dimension_numbers = #tpu.dot_dimension_numbers<[1], [0], [0], [1], [0, 0, 1, 1], [], []>} : vector<64x16xf32>, vector<16x8xf32>, vector<64x8xf32> -> vector<64x8xf32>
    %115 = arith.addf %113, %114 : vector<64x8xf32>
    %116 = arith.addf %115, %7 : vector<64x8xf32>
    %117 = vector.extract_strided_slice %116 {offsets = [0, 0], sizes = [48, 8], strides = [1, 1]} : vector<64x8xf32> to vector<48x8xf32>
    %cst_42 = arith.constant 5.000000e-01 : f32
    %118 = vector.broadcast %cst_42 : f32 to vector<48x8xf32>
    %119 = arith.mulf %118, %117 : vector<48x8xf32>
    %120 = math.tanh %119 : vector<48x8xf32>
    %cst_43 = arith.constant 1.000000e+00 : f32
    %121 = vector.broadcast %cst_43 : f32 to vector<48x8xf32>
    %122 = arith.addf %120, %121 : vector<48x8xf32>
    %cst_44 = arith.constant 5.000000e-01 : f32
    %123 = vector.broadcast %cst_44 : f32 to vector<48x8xf32>
    %124 = arith.mulf %123, %122 : vector<48x8xf32>
    %125 = vector.extract_strided_slice %116 {offsets = [48, 0], sizes = [16, 8], strides = [1, 1]} : vector<64x8xf32> to vector<16x8xf32>
    %126 = math.tanh %125 : vector<16x8xf32>
    %127 = vector.extract_strided_slice %124 {offsets = [0, 0], sizes = [16, 8], strides = [1, 1]} : vector<48x8xf32> to vector<16x8xf32>
    %128 = vector.extract_strided_slice %124 {offsets = [16, 0], sizes = [16, 8], strides = [1, 1]} : vector<48x8xf32> to vector<16x8xf32>
    %129 = vector.extract_strided_slice %124 {offsets = [32, 0], sizes = [16, 8], strides = [1, 1]} : vector<48x8xf32> to vector<16x8xf32>
    %130 = arith.mulf %128, %107 : vector<16x8xf32>
    %131 = arith.mulf %127, %126 : vector<16x8xf32>
    %132 = arith.addf %130, %131 : vector<16x8xf32>
    %133 = math.tanh %132 : vector<16x8xf32>
    %134 = arith.mulf %129, %133 : vector<16x8xf32>
    %c5_i32 = arith.constant 5 : i32
    %135 = arith.index_cast %c5_i32 : i32 to index
    %c0_45 = arith.constant 0 : index
    %c0_46 = arith.constant 0 : index
    %136 = vector.load %arg2[%135, %c0_45, %c0_46] : memref<8x8x8xf32, #tpu.memory_space<vmem>>, vector<1x8x8xf32>
    %137 = vector.shape_cast %136 : vector<1x8x8xf32> to vector<8x8xf32>
    %cst_47 = arith.constant dense<0.000000e+00> : vector<64x8xf32>
    %138 = tpu.matmul %3, %137, %cst_47 {dimension_numbers = #tpu.dot_dimension_numbers<[1], [0], [0], [1], [0, 0, 1, 1], [], []>} : vector<64x8xf32>, vector<8x8xf32>, vector<64x8xf32> -> vector<64x8xf32>
    %cst_48 = arith.constant dense<0.000000e+00> : vector<64x8xf32>
    %139 = tpu.matmul %4, %134, %cst_48 {dimension_numbers = #tpu.dot_dimension_numbers<[1], [0], [0], [1], [0, 0, 1, 1], [], []>} : vector<64x16xf32>, vector<16x8xf32>, vector<64x8xf32> -> vector<64x8xf32>
    %140 = arith.addf %138, %139 : vector<64x8xf32>
    %141 = arith.addf %140, %7 : vector<64x8xf32>
    %142 = vector.extract_strided_slice %141 {offsets = [0, 0], sizes = [48, 8], strides = [1, 1]} : vector<64x8xf32> to vector<48x8xf32>
    %cst_49 = arith.constant 5.000000e-01 : f32
    %143 = vector.broadcast %cst_49 : f32 to vector<48x8xf32>
    %144 = arith.mulf %143, %142 : vector<48x8xf32>
    %145 = math.tanh %144 : vector<48x8xf32>
    %cst_50 = arith.constant 1.000000e+00 : f32
    %146 = vector.broadcast %cst_50 : f32 to vector<48x8xf32>
    %147 = arith.addf %145, %146 : vector<48x8xf32>
    %cst_51 = arith.constant 5.000000e-01 : f32
    %148 = vector.broadcast %cst_51 : f32 to vector<48x8xf32>
    %149 = arith.mulf %148, %147 : vector<48x8xf32>
    %150 = vector.extract_strided_slice %141 {offsets = [48, 0], sizes = [16, 8], strides = [1, 1]} : vector<64x8xf32> to vector<16x8xf32>
    %151 = math.tanh %150 : vector<16x8xf32>
    %152 = vector.extract_strided_slice %149 {offsets = [0, 0], sizes = [16, 8], strides = [1, 1]} : vector<48x8xf32> to vector<16x8xf32>
    %153 = vector.extract_strided_slice %149 {offsets = [16, 0], sizes = [16, 8], strides = [1, 1]} : vector<48x8xf32> to vector<16x8xf32>
    %154 = vector.extract_strided_slice %149 {offsets = [32, 0], sizes = [16, 8], strides = [1, 1]} : vector<48x8xf32> to vector<16x8xf32>
    %155 = arith.mulf %153, %132 : vector<16x8xf32>
    %156 = arith.mulf %152, %151 : vector<16x8xf32>
    %157 = arith.addf %155, %156 : vector<16x8xf32>
    %158 = math.tanh %157 : vector<16x8xf32>
    %159 = arith.mulf %154, %158 : vector<16x8xf32>
    %c6_i32 = arith.constant 6 : i32
    %160 = arith.index_cast %c6_i32 : i32 to index
    %c0_52 = arith.constant 0 : index
    %c0_53 = arith.constant 0 : index
    %161 = vector.load %arg2[%160, %c0_52, %c0_53] : memref<8x8x8xf32, #tpu.memory_space<vmem>>, vector<1x8x8xf32>
    %162 = vector.shape_cast %161 : vector<1x8x8xf32> to vector<8x8xf32>
    %cst_54 = arith.constant dense<0.000000e+00> : vector<64x8xf32>
    %163 = tpu.matmul %3, %162, %cst_54 {dimension_numbers = #tpu.dot_dimension_numbers<[1], [0], [0], [1], [0, 0, 1, 1], [], []>} : vector<64x8xf32>, vector<8x8xf32>, vector<64x8xf32> -> vector<64x8xf32>
    %cst_55 = arith.constant dense<0.000000e+00> : vector<64x8xf32>
    %164 = tpu.matmul %4, %159, %cst_55 {dimension_numbers = #tpu.dot_dimension_numbers<[1], [0], [0], [1], [0, 0, 1, 1], [], []>} : vector<64x16xf32>, vector<16x8xf32>, vector<64x8xf32> -> vector<64x8xf32>
    %165 = arith.addf %163, %164 : vector<64x8xf32>
    %166 = arith.addf %165, %7 : vector<64x8xf32>
    %167 = vector.extract_strided_slice %166 {offsets = [0, 0], sizes = [48, 8], strides = [1, 1]} : vector<64x8xf32> to vector<48x8xf32>
    %cst_56 = arith.constant 5.000000e-01 : f32
    %168 = vector.broadcast %cst_56 : f32 to vector<48x8xf32>
    %169 = arith.mulf %168, %167 : vector<48x8xf32>
    %170 = math.tanh %169 : vector<48x8xf32>
    %cst_57 = arith.constant 1.000000e+00 : f32
    %171 = vector.broadcast %cst_57 : f32 to vector<48x8xf32>
    %172 = arith.addf %170, %171 : vector<48x8xf32>
    %cst_58 = arith.constant 5.000000e-01 : f32
    %173 = vector.broadcast %cst_58 : f32 to vector<48x8xf32>
    %174 = arith.mulf %173, %172 : vector<48x8xf32>
    %175 = vector.extract_strided_slice %166 {offsets = [48, 0], sizes = [16, 8], strides = [1, 1]} : vector<64x8xf32> to vector<16x8xf32>
    %176 = math.tanh %175 : vector<16x8xf32>
    %177 = vector.extract_strided_slice %174 {offsets = [0, 0], sizes = [16, 8], strides = [1, 1]} : vector<48x8xf32> to vector<16x8xf32>
    %178 = vector.extract_strided_slice %174 {offsets = [16, 0], sizes = [16, 8], strides = [1, 1]} : vector<48x8xf32> to vector<16x8xf32>
    %179 = vector.extract_strided_slice %174 {offsets = [32, 0], sizes = [16, 8], strides = [1, 1]} : vector<48x8xf32> to vector<16x8xf32>
    %180 = arith.mulf %178, %157 : vector<16x8xf32>
    %181 = arith.mulf %177, %176 : vector<16x8xf32>
    %182 = arith.addf %180, %181 : vector<16x8xf32>
    %183 = math.tanh %182 : vector<16x8xf32>
    %184 = arith.mulf %179, %183 : vector<16x8xf32>
    %c7_i32 = arith.constant 7 : i32
    %185 = arith.index_cast %c7_i32 : i32 to index
    %c0_59 = arith.constant 0 : index
    %c0_60 = arith.constant 0 : index
    %186 = vector.load %arg2[%185, %c0_59, %c0_60] : memref<8x8x8xf32, #tpu.memory_space<vmem>>, vector<1x8x8xf32>
    %187 = vector.shape_cast %186 : vector<1x8x8xf32> to vector<8x8xf32>
    %cst_61 = arith.constant dense<0.000000e+00> : vector<64x8xf32>
    %188 = tpu.matmul %3, %187, %cst_61 {dimension_numbers = #tpu.dot_dimension_numbers<[1], [0], [0], [1], [0, 0, 1, 1], [], []>} : vector<64x8xf32>, vector<8x8xf32>, vector<64x8xf32> -> vector<64x8xf32>
    %cst_62 = arith.constant dense<0.000000e+00> : vector<64x8xf32>
    %189 = tpu.matmul %4, %184, %cst_62 {dimension_numbers = #tpu.dot_dimension_numbers<[1], [0], [0], [1], [0, 0, 1, 1], [], []>} : vector<64x16xf32>, vector<16x8xf32>, vector<64x8xf32> -> vector<64x8xf32>
    %190 = arith.addf %188, %189 : vector<64x8xf32>
    %191 = arith.addf %190, %7 : vector<64x8xf32>
    %192 = vector.extract_strided_slice %191 {offsets = [0, 0], sizes = [48, 8], strides = [1, 1]} : vector<64x8xf32> to vector<48x8xf32>
    %cst_63 = arith.constant 5.000000e-01 : f32
    %193 = vector.broadcast %cst_63 : f32 to vector<48x8xf32>
    %194 = arith.mulf %193, %192 : vector<48x8xf32>
    %195 = math.tanh %194 : vector<48x8xf32>
    %cst_64 = arith.constant 1.000000e+00 : f32
    %196 = vector.broadcast %cst_64 : f32 to vector<48x8xf32>
    %197 = arith.addf %195, %196 : vector<48x8xf32>
    %cst_65 = arith.constant 5.000000e-01 : f32
    %198 = vector.broadcast %cst_65 : f32 to vector<48x8xf32>
    %199 = arith.mulf %198, %197 : vector<48x8xf32>
    %200 = vector.extract_strided_slice %191 {offsets = [48, 0], sizes = [16, 8], strides = [1, 1]} : vector<64x8xf32> to vector<16x8xf32>
    %201 = math.tanh %200 : vector<16x8xf32>
    %202 = vector.extract_strided_slice %199 {offsets = [0, 0], sizes = [16, 8], strides = [1, 1]} : vector<48x8xf32> to vector<16x8xf32>
    %203 = vector.extract_strided_slice %199 {offsets = [16, 0], sizes = [16, 8], strides = [1, 1]} : vector<48x8xf32> to vector<16x8xf32>
    %204 = vector.extract_strided_slice %199 {offsets = [32, 0], sizes = [16, 8], strides = [1, 1]} : vector<48x8xf32> to vector<16x8xf32>
    %205 = arith.mulf %203, %182 : vector<16x8xf32>
    %206 = arith.mulf %202, %201 : vector<16x8xf32>
    %207 = arith.addf %205, %206 : vector<16x8xf32>
    %208 = math.tanh %207 : vector<16x8xf32>
    %209 = arith.mulf %204, %208 : vector<16x8xf32>
    %c8_i32 = arith.constant 8 : i32
    %c0_66 = arith.constant 0 : index
    %c0_67 = arith.constant 0 : index
    %210 = vector.load %arg11[%c0_66, %c0_67] : memref<16x8xf32, #tpu.memory_space<vmem>>, vector<16x8xf32>
    tpu.vector_store %arg11[%c0_66, %c0_67], %209 {strides = array<i32>} : memref<16x8xf32, #tpu.memory_space<vmem>>, vector<16x8xf32>,
    %c0_68 = arith.constant 0 : index
    %c0_69 = arith.constant 0 : index
    %211 = vector.load %arg12[%c0_68, %c0_69] : memref<16x8xf32, #tpu.memory_space<vmem>>, vector<16x8xf32>
    tpu.vector_store %arg12[%c0_68, %c0_69], %207 {strides = array<i32>} : memref<16x8xf32, #tpu.memory_space<vmem>>, vector<16x8xf32>,
    %c0_i32_70 = arith.constant 0 : i32
    %212 = arith.cmpi eq, %arg1, %c0_i32_70 : i32
    %213 = arith.extui %212 : i1 to i32
    %c0_i32_71 = arith.constant 0 : i32
    %214 = arith.cmpi ne, %213, %c0_i32_71 : i32
    scf.if %214 {
      %c0_72 = arith.constant 0 : index
      %c0_73 = arith.constant 0 : index
      %215 = vector.load %arg6[%c0_72, %c0_73] : memref<64x8xf32, #tpu.memory_space<vmem>>, vector<64x8xf32>
      %c7 = arith.constant 7 : index
      %c0_74 = arith.constant 0 : index
      %c0_75 = arith.constant 0 : index
      %216 = vector.load %arg2[%c7, %c0_74, %c0_75] : memref<8x8x8xf32, #tpu.memory_space<vmem>>, vector<1x8x8xf32>
      %217 = vector.shape_cast %216 : vector<1x8x8xf32> to vector<8x8xf32>
      %cst_76 = arith.constant dense<0.000000e+00> : vector<64x8xf32>
      %218 = tpu.matmul %215, %217, %cst_76 {dimension_numbers = #tpu.dot_dimension_numbers<[1], [0], [0], [1], [0, 0, 1, 1], [], []>} : vector<64x8xf32>, vector<8x8xf32>, vector<64x8xf32> -> vector<64x8xf32>
      %c0_77 = arith.constant 0 : index
      %c0_78 = arith.constant 0 : index
      %219 = vector.load %arg7[%c0_77, %c0_78] : memref<64x1xf32, #tpu.memory_space<vmem>>, vector<64x1xf32>
      %220 = vector.shape_cast %219 : vector<64x1xf32> to vector<64x1xf32>
      %221 = vector.broadcast %220 : vector<64x1xf32> to vector<64x8xf32>
      %222 = arith.addf %218, %221 : vector<64x8xf32>
      %cst_79 = arith.constant 0.000000e+00 : f32
      %223 = vector.broadcast %cst_79 : f32 to vector<16x8xf32>
      %224 = vector.extract_strided_slice %222 {offsets = [0, 0], sizes = [48, 8], strides = [1, 1]} : vector<64x8xf32> to vector<48x8xf32>
      %cst_80 = arith.constant 5.000000e-01 : f32
      %225 = vector.broadcast %cst_80 : f32 to vector<48x8xf32>
      %226 = arith.mulf %225, %224 : vector<48x8xf32>
      %227 = math.tanh %226 : vector<48x8xf32>
      %cst_81 = arith.constant 1.000000e+00 : f32
      %228 = vector.broadcast %cst_81 : f32 to vector<48x8xf32>
      %229 = arith.addf %227, %228 : vector<48x8xf32>
      %cst_82 = arith.constant 5.000000e-01 : f32
      %230 = vector.broadcast %cst_82 : f32 to vector<48x8xf32>
      %231 = arith.mulf %230, %229 : vector<48x8xf32>
      %232 = vector.extract_strided_slice %222 {offsets = [48, 0], sizes = [16, 8], strides = [1, 1]} : vector<64x8xf32> to vector<16x8xf32>
      %233 = math.tanh %232 : vector<16x8xf32>
      %234 = vector.extract_strided_slice %231 {offsets = [0, 0], sizes = [16, 8], strides = [1, 1]} : vector<48x8xf32> to vector<16x8xf32>
      %235 = vector.extract_strided_slice %231 {offsets = [16, 0], sizes = [16, 8], strides = [1, 1]} : vector<48x8xf32> to vector<16x8xf32>
      %236 = vector.extract_strided_slice %231 {offsets = [32, 0], sizes = [16, 8], strides = [1, 1]} : vector<48x8xf32> to vector<16x8xf32>
      %237 = arith.mulf %235, %223 : vector<16x8xf32>
      %238 = arith.mulf %234, %233 : vector<16x8xf32>
      %239 = arith.addf %237, %238 : vector<16x8xf32>
      %240 = math.tanh %239 : vector<16x8xf32>
      %241 = arith.mulf %236, %240 : vector<16x8xf32>
      %242 = tpu.concatenate %209, %241 in 0 : vector<16x8xf32>, vector<16x8xf32> -> vector<32x8xf32>
      %c0_83 = arith.constant 0 : index
      %c0_84 = arith.constant 0 : index
      %243 = vector.load %arg8[%c0_83, %c0_84] : memref<1x32xf32, #tpu.memory_space<vmem>>, vector<1x32xf32>
      %cst_85 = arith.constant dense<0.000000e+00> : vector<1x8xf32>
      %244 = tpu.matmul %243, %242, %cst_85 {dimension_numbers = #tpu.dot_dimension_numbers<[1], [0], [0], [1], [0, 0, 1, 1], [], []>} : vector<1x32xf32>, vector<32x8xf32>, vector<1x8xf32> -> vector<1x8xf32>
      %c0_86 = arith.constant 0 : index
      %c0_87 = arith.constant 0 : index
      %245 = vector.load %arg9[%c0_86, %c0_87] : memref<1x1xf32, #tpu.memory_space<vmem>>, vector<1x1xf32>
      %246 = vector.broadcast %245 : vector<1x1xf32> to vector<1x8xf32>
      %247 = arith.addf %244, %246 : vector<1x8xf32>
      %cst_88 = arith.constant 5.000000e-01 : f32
      %248 = vector.broadcast %cst_88 : f32 to vector<1x8xf32>
      %249 = arith.mulf %248, %247 : vector<1x8xf32>
      %250 = math.tanh %249 : vector<1x8xf32>
      %cst_89 = arith.constant 1.000000e+00 : f32
      %251 = vector.broadcast %cst_89 : f32 to vector<1x8xf32>
      %252 = arith.addf %250, %251 : vector<1x8xf32>
      %cst_90 = arith.constant 5.000000e-01 : f32
      %253 = vector.broadcast %cst_90 : f32 to vector<1x8xf32>
      %254 = arith.mulf %253, %252 : vector<1x8xf32>
      %c0_91 = arith.constant 0 : index
      %c0_92 = arith.constant 0 : index
      %255 = vector.load %arg10[%c0_91, %c0_92] : memref<1x8xf32, #tpu.memory_space<vmem>>, vector<1x8xf32>
      tpu.vector_store %arg10[%c0_91, %c0_92], %254 {strides = array<i32>} : memref<1x8xf32, #tpu.memory_space<vmem>>, vector<1x8xf32>,
    } else {
    }
    return
  }
  func.func @transform_0(%arg0: i32, %arg1: i32) -> (i32, i32, i32) {
    %c0_i32 = arith.constant 0 : i32
    %c0_i32_0 = arith.constant 0 : i32
    return %arg1, %c0_i32, %arg0 : i32, i32, i32
  }
  func.func @transform_1(%arg0: i32, %arg1: i32) -> (i32, i32) {
    %c0_i32 = arith.constant 0 : i32
    %c0_i32_0 = arith.constant 0 : i32
    %c0_i32_1 = arith.constant 0 : i32
    return %c0_i32, %c0_i32_0 : i32, i32
  }
  func.func @transform_2(%arg0: i32, %arg1: i32) -> (i32, i32) {
    %c0_i32 = arith.constant 0 : i32
    %c0_i32_0 = arith.constant 0 : i32
    %c0_i32_1 = arith.constant 0 : i32
    return %c0_i32, %c0_i32_0 : i32, i32
  }
  func.func @transform_3(%arg0: i32, %arg1: i32) -> (i32, i32) {
    %c0_i32 = arith.constant 0 : i32
    %c0_i32_0 = arith.constant 0 : i32
    %c0_i32_1 = arith.constant 0 : i32
    return %c0_i32, %c0_i32_0 : i32, i32
  }
  func.func @transform_4(%arg0: i32, %arg1: i32) -> (i32, i32) {
    %c0_i32 = arith.constant 0 : i32
    %c0_i32_0 = arith.constant 0 : i32
    %c0_i32_1 = arith.constant 0 : i32
    return %c0_i32, %c0_i32_0 : i32, i32
  }
  func.func @transform_5(%arg0: i32, %arg1: i32) -> (i32, i32) {
    %c0_i32 = arith.constant 0 : i32
    %c0_i32_0 = arith.constant 0 : i32
    %c0_i32_1 = arith.constant 0 : i32
    return %c0_i32, %c0_i32_0 : i32, i32
  }
  func.func @transform_6(%arg0: i32, %arg1: i32) -> (i32, i32) {
    %c0_i32 = arith.constant 0 : i32
    %c0_i32_0 = arith.constant 0 : i32
    %c0_i32_1 = arith.constant 0 : i32
    return %c0_i32, %c0_i32_0 : i32, i32
  }
  func.func @transform_7(%arg0: i32, %arg1: i32) -> (i32, i32) {
    %c0_i32 = arith.constant 0 : i32
    %c0_i32_0 = arith.constant 0 : i32
    %c0_i32_1 = arith.constant 0 : i32
    return %c0_i32, %c0_i32_0 : i32, i32
  }
  func.func @transform_8(%arg0: i32, %arg1: i32) -> (i32, i32) {
    %c0_i32 = arith.constant 0 : i32
    %c0_i32_0 = arith.constant 0 : i32
    return %c0_i32, %arg0 : i32, i32
  }
}

</mosaic_0001>

<bundles_post_ra>
// kernel: tpu_custom_call.1
= control target key start
LH: loop header
LB: loop body
LE: loop exit
PB: predicated region body
PF: predicated region fallthrough
CT: control target
= control target key end

     0   :  { %s4200_s0 = inlined_call_operand.vmem [shape: f32[8,8,8], index: 0, kind: input, shape index: {}]   ;;  %s4201_s1 = inlined_call_operand.vmem [shape: f32[64,8], index: 1, kind: input, shape index: {}]   ;;  %s4202_s2 = inlined_call_operand.vmem [shape: f32[64,16], index: 2, kind: input, shape index: {}]   ;;  %s4203_s3 = inlined_call_operand.vmem [shape: f32[64,1], index: 3, kind: input, shape index: {}]   ;;  %s4204_s4 = inlined_call_operand.vmem [shape: f32[64,8], index: 4, kind: input, shape index: {}]   ;;  %s4205_s5 = inlined_call_operand.vmem [shape: f32[64,1], index: 5, kind: input, shape index: {}]   ;;  %s4206_s6 = inlined_call_operand.vmem [shape: f32[1,32], index: 6, kind: input, shape index: {}]   ;;  %s4207_s7 = inlined_call_operand.<no memory space> [shape: f32[1,1], index: 7, kind: input, shape index: {}]   ;;  %s4208_s8 = inlined_call_operand.hbm [shape: f32[1,8], index: 8, kind: output, shape index: {}]  }
   0x1   :  { %v13_v0 = vstv %s4207_s7 }
   0x2   :  { %14 = vst [vmem:[#allocation4] sm:$0x1] %v13_v0 }
   0x3   :  { %vm36_vm0 = vcmask 64512   ;;  %v3505_v1 = vld [vmem:[%s4202_s2] sm:$0xff]  ;;  %vm110_vm1 = vcmask 130048   ;;  %v3449_v2 = vmov 0.0   ;;  %v3450_v3 = vmov 0   ;;  %v3520_v4 = vld [vmem:[%s4202_s2 + $0x30] sm:$0xff] }
   0x4   :  { %37 = vst.msk [vmem:[#allocation2] sm:$0xff] %vm36_vm0, %v3449_v2  ;;  %38 = vst.msk [vmem:[#allocation2 + $0x8] sm:$0xff] %vm36_vm0, %v3449_v2  ;;  %2855 = vmatprep.mubr.msk.f32.mxu0 %vm110_vm1, %v3505_v1  ;;  %3225 = vset.pattern.permute.xlu0 %v3450_v3  ;;  %v57_v5 = vld [vmem:[%s4203_s3] sm:$0xff]  ;;  %v59_v6 = vld [vmem:[%s4203_s3 + $0x10] sm:$0xff] }
   0x5   :  { %39 = vst.msk [vmem:[#allocation3] sm:$0xff] %vm36_vm0, %v3449_v2  ;;  %40 = vst.msk [vmem:[#allocation3 + $0x8] sm:$0xff] %vm36_vm0, %v3449_v2  ;;  %3226 = vset.pattern.permute.xlu1 %v3450_v3  ;;  %2864 = vmatprep.mubr.msk.f32.mxu1 %vm110_vm1, %v3520_v4  ;;  %v58_v7 = vld [vmem:[%s4203_s3 + $0x8] sm:$0xff]  ;;  %v109_v11 = vld [vmem:[%s4200_s0] sm:$0xff] }
   0x6   :  { %67 = vperm.xlu0 %3225, %v57_v5   ;;  %77 = vperm.xlu1 %3226, %v59_v6   ;;  %v60_v12 = vld [vmem:[%s4203_s3 + $0x18] sm:$0xff]  ;;  %v63_v13 = vld [vmem:[%s4203_s3 + $0x30] sm:$0xff]  ;;  %v3545_v14 = vld [vmem:[%s4202_s2 + $0x8] sm:$0xff] }
   0x7   :  { %v3550_v15 = vld [vmem:[%s4202_s2 + $0x38] sm:$0xff] }
   0xa   :  { %72 = vperm.xlu0 %3225, %v58_v7  }
   0xb   :  { %v105_v8 = vld [vmem:[#allocation2] sm:$0xff]  ;;  %v106_v9 = vld [vmem:[#allocation2 + $0x8] sm:$0xff] }
   0xc   :  { %v3116_v10 = vpack.c.bf16 %v106_v9, %v105_v8 }
   0xe   :  { %3117 = vmatprep.subr.bf16.mxu0 %v3116_v10  ;;  %3154 = vmatprep.subr.bf16.mxu1 %v3116_v10 }
   0xf   :  { %3119 = vmatpush3.bf16.msra.mxu0 %v3116_v10  ;;  %3155 = vmatpush3.bf16.msra.mxu1 %v3116_v10 }
  0x10   :  { %15 = vsyncpa [#allocation6], 0  ;;  %v3555_v16 = vld [vmem:[%s4202_s2 + $0x10] sm:$0xff]  ;;  %2867 = vmatprep.subr.mxu0 %v109_v11  ;;  %82 = vperm.xlu1 %3226, %v60_v12   ;;  %v64_v17 = vld [vmem:[%s4203_s3 + $0x38] sm:$0xff]  ;;  %vm3452_vm2 = vmmov 0   ;;  %vm2446_vm3 = vcmask 261120  }
  0x11   :  { %97 = vperm.xlu0 %3225, %v63_v13   ;;  %v61_v18 = vld [vmem:[%s4203_s3 + $0x20] sm:$0xff]  ;;  %v3572_v19 = vld [vmem:[%s4202_s2 + $0x18] sm:$0xff]  ;;  %v62_v21 = vld [vmem:[%s4203_s3 + $0x28] sm:$0xff]  ;;  %s3453_s7 = smov [#allocation5]   ;;  %vm2524_vm4 = vcmask 57344  }
  0x12   :  { %2856 = vmatmul.mubr.msk.f32.vlgmr.msra.gmra.mrb[0].mxu0 %vm110_vm1, %v3545_v14  ;;  %2865 = vmatmul.mubr.msk.f32.vlgmr.msra.gmra.mrb[0].mxu1 %vm110_vm1, %v3550_v15  ;;  %v3577_v20 = vld [vmem:[%s4202_s2 + $0x20] sm:$0xff]  ;;  %v3594_v23 = vld [vmem:[%s4202_s2 + $0x28] sm:$0xff]  ;;  %v2224_v26 = vld [vmem:[%s4205_s5 + $0x10] sm:$0xff]  ;;  %s2532_s9 = sshll.u32 %s3453_s7, 4  ;;  %s2533_s9 = int_to_ptr.vmem [resolvable:$true] %s2532_s9 }
  0x13   :  { %2858 = vmatprep.mubr.msk.f32.mxu0 %vm110_vm1, %v3555_v16  ;;  %2868 = vmatpush3.msra.mxu0 %v109_v11  ;;  %v2222_v22 = vld [vmem:[%s4205_s5] sm:$0xff]  ;;  %v2223_v25 = vld [vmem:[%s4205_s5 + $0x8] sm:$0xff]  ;;  %v3619_v28 = vld [vmem:[%s4201_s1 + $0x10] sm:$0xff]  ;;  %s3429_s10 = scalar_lea.vmem %s2533_s9, 32  ;;  %p3430_p1 = scmp.lt.s32.totalorder %s2533_s9, %s2533_s9 }
  0x14   :  { %102 = vperm.xlu1 %3226, %v64_v17   ;;  %2885 = vmatprep.mubr.msk.f32.mxu1 %vm110_vm1, %v3505_v1  ;;  %v3599_v24 = vld [vmem:[%s4201_s1] sm:$0xff]  ;;  %v3614_v27 = vld [vmem:[%s4201_s1 + $0x8] sm:$0xff]  ;;  %v2225_v29 = vld [vmem:[%s4205_s5 + $0x18] sm:$0xff] }
  0x15   :  { %87 = vperm.xlu0 %3225, %v61_v18   ;;  %v2228_v30 = vld [vmem:[%s4205_s5 + $0x30] sm:$0xff]  ;;  %v3634_v31 = vld [vmem:[%s4201_s1 + $0x18] sm:$0xff]  ;;  %v3639_v32 = vld [vmem:[%s4201_s1 + $0x20] sm:$0xff] }
  0x16   :  { %2859 = vmatmul.mubr.msk.f32.gmra.mrb[2].mxu0 %vm110_vm1, %v3572_v19  ;;  %v2229_v33 = vld [vmem:[%s4205_s5 + $0x38] sm:$0xff]  ;;  %v2226_v34 = vld [vmem:[%s4205_s5 + $0x20] sm:$0xff]  ;;  %v3654_v35 = vld [vmem:[%s4201_s1 + $0x28] sm:$0xff] }
  0x17   :  { %2861 = vmatprep.mubr.msk.f32.mxu0 %vm110_vm1, %v3577_v20  ;;  %v3659_v36 = vld [vmem:[%s4201_s1 + $0x30] sm:$0xff]  ;;  %v2227_v37 = vld [vmem:[%s4205_s5 + $0x28] sm:$0xff]  ;;  %v2436_v38 = vld [vmem:[#allocation4] sm:$0x1] }
  0x18   :  { %92 = vperm.xlu1 %3226, %v62_v21   ;;  %v3671_v39 = vld [vmem:[%s4201_s1 + $0x38] sm:$0xff] }
  0x19   :  { %2232 = vperm.xlu0 %3225, %v2222_v22  }
  0x1a   :  { %2862 = vmatmul.mubr.msk.f32.gmra.mrb[4].mxu0 %vm110_vm1, %v3594_v23 }
  0x1b   :  { %2869 = vmatprep.mubr.msk.f32.mxu0 %vm36_vm0, %v3599_v24 }
  0x1c   :  { %2237 = vperm.xlu1 %3226, %v2223_v25  }
  0x1d   :  { %2242 = vperm.xlu0 %3225, %v2224_v26  }
  0x1e   :  { %2870 = vmatmul.mubr.msk.f32.vlgmr.msra.gmra.mrb[0].mxu0 %vm36_vm0, %v3614_v27 }
  0x1f   :  { %2872 = vmatprep.mubr.msk.f32.mxu0 %vm36_vm0, %v3619_v28 }
  0x20   :  { %2247 = vperm.xlu1 %3226, %v2225_v29  }
  0x21   :  { %2262 = vperm.xlu0 %3225, %v2228_v30  }
  0x22   :  { %2873 = vmatmul.mubr.msk.f32.gmra.mrb[2].mxu0 %vm36_vm0, %v3634_v31 }
  0x23   :  { %2875 = vmatprep.mubr.msk.f32.mxu0 %vm36_vm0, %v3639_v32 }
  0x24   :  { %2267 = vperm.xlu1 %3226, %v2229_v33   ;;  %v108_v33 = vld [vmem:[#allocation3 + $0x8] sm:$0xff] }
  0x25   :  { %2252 = vperm.xlu0 %3225, %v2226_v34  }
  0x26   :  { %2876 = vmatmul.mubr.msk.f32.gmra.mrb[4].mxu0 %vm36_vm0, %v3654_v35 }
  0x27   :  { %2878 = vmatprep.mubr.msk.f32.mxu0 %vm36_vm0, %v3659_v36 }
  0x28   :  { %2257 = vperm.xlu1 %3226, %v2227_v37  }
  0x29   :  { %2439 = vperm.xlu0 %3225, %v2436_v38   ;;  %v107_v38 = vld [vmem:[#allocation3] sm:$0xff] }
  0x2a   :  { %2879 = vmatmul.mubr.msk.f32.gmra.mrb[6].mxu0 %vm36_vm0, %v3671_v39 }
  0x2b   :  { %2915 = vmatprep.mubr.msk.f32.mxu0 %vm110_vm1, %v3505_v1 }
  0x85   :  { %v3677_v42 = vpop.permute.xlu0 %67  ;;  %v3679_v43 = vpop.permute.xlu1 %77 }
  0x89   :  { %v3681_v44 = vpop.permute.xlu0 %72 }
  0x8f   :  { %v3685_v49 = vpop.permute.xlu1 %82 }
  0x90   :  { %v3691_v61 = vpop.permute.xlu0 %97 }
  0x93   :  { %v3689_v59 = vpop.permute.xlu1 %102 }
  0x94   :  { %v3696_v7 = vpop.permute.xlu0 %87 }
  0x97   :  { %v3693_v5 = vpop.permute.xlu1 %92 }
  0xe5   :  { %v2866_v40 = vpop.f32.mrb[0].mxu1 }
  0xe6   :  { %v231_v41 = vpop.f32.mrb[1].mxu1 }
  0xf1   :  { %v2871_v45 = vpop.f32.mrb[0].mxu0 }
  0xf2   :  { %v371_v46 = vadd.f32 %v2871_v45, %v3681_v44  ;;  %v331_v47 = vpop.f32.mrb[1].mxu0 }
  0xf3   :  { %v370_v48 = vadd.f32 %v331_v47, %v3677_v42 }
  0xf4   :  { %v379_v50 = vmul.f32 0.5, %v371_v46 }
  0xf5   :  { %v378_v51 = vmul.f32 0.5, %v370_v48  ;;  %v2874_v52 = vpop.f32.mrb[2].mxu0 }
  0xf6   :  { %v373_v53 = vadd.f32 %v2874_v52, %v3685_v49  ;;  %v341_v54 = vpop.f32.mrb[3].mxu0  ;;  %3227 = vtanh.f32 %v379_v50 }
  0xf7   :  { %v372_v55 = vadd.f32 %v341_v54, %v3679_v43  ;;  %3229 = vtanh.f32 %v378_v51 }
  0xf8   :  { %v381_v56 = vmul.f32 0.5, %v373_v53 }
  0xf9   :  { %v380_v57 = vmul.f32 0.5, %v372_v55  ;;  %v2877_v58 = vpop.f32.mrb[4].mxu0 }
  0xfa   :  { %3231 = vtanh.f32 %v381_v56  ;;  %v351_v60 = vpop.f32.mrb[5].mxu0  ;;  %v375_v8 = vadd.f32 %v2877_v58, %v3693_v5 }
  0xfb   :  { %3233 = vtanh.f32 %v380_v57  ;;  %v374_v11 = vadd.f32 %v351_v60, %v3696_v7 }
  0xfc   :  { %v383_v21 = vmul.f32 0.5, %v375_v8 }
  0xfd   :  { %v2880_v62 = vpop.f32.mrb[6].mxu0  ;;  %v382_v25 = vmul.f32 0.5, %v374_v11 }
  0xfe   :  { %v367_v63 = vadd.f32 %v2880_v62, %v2866_v40  ;;  %v361_v0 = vpop.f32.mrb[7].mxu0 }
  0xff   :  { %v362_v3 = vadd.f32 %v361_v0, %v231_v41 }
 0x100   :  { %v377_v6 = vadd.f32 %v367_v63, %v3689_v59  ;;  %v3228_v10 = vpop.eup %3227 }
 0x101   :  { %v376_v9 = vadd.f32 %v362_v3, %v3691_v61  ;;  %v3230_v12 = vpop.eup %3229  ;;  %v391_v26 = vadd.f32 1.0, %v3228_v10 }
 0x102   :  { %3235 = vtanh.f32 %v377_v6  ;;  %v390_v29 = vadd.f32 1.0, %v3230_v12  ;;  %v2556_v6 = vld [vmem:[%s4200_s0 + $0x8] sm:$0xff] }
 0x103   :  { %3237 = vtanh.f32 %v376_v9  ;;  %v397_v37 = vmul.f32 0.5, %v391_v26 }
 0x104   :  { %v3232_v13 = vpop.eup %3231  ;;  %3239 = vtanh.f32 %v383_v21  ;;  %v396_v41 = vmul.f32 0.5, %v390_v29 }
 0x105   :  { %v3234_v17 = vpop.eup %3233  ;;  %v393_v18 = vadd.f32 1.0, %v3232_v13  ;;  %3241 = vtanh.f32 %v382_v25 }
 0x106   :  { %v392_v22 = vadd.f32 1.0, %v3234_v17 }
 0x107   :  { %v399_v30 = vmul.f32 0.5, %v393_v18 }
 0x108   :  { %v398_v34 = vmul.f32 0.5, %v392_v22 }
 0x109   :  { %v405_v46 = vmul.f32 %v399_v30, %v108_v33 }
 0x10a   :  { %v404_v48 = vmul.f32 %v398_v34, %v107_v38 }
 0x10c   :  { %v3236_v40 = vpop.eup %3235 }
 0x10d   :  { %v3238_v45 = vpop.eup %3237  ;;  %v407_v47 = vmul.f32 %v3236_v40, %v397_v37 }
 0x10e   :  { %v406_v50 = vmul.f32 %v3238_v45, %v396_v41  ;;  %v3240_v53 = vpop.eup %3239 }
 0x10f   :  { %v3701_v51 = vadd.f32 %v407_v47, %v405_v46  ;;  %v3242_v54 = vpop.eup %3241  ;;  %v395_v55 = vadd.f32 1.0, %v3240_v53 }
 0x110   :  { %v3703_v52 = vadd.f32 %v406_v50, %v404_v48  ;;  %v394_v56 = vadd.f32 1.0, %v3242_v54 }
 0x111   :  { %3243 = vtanh.f32 %v3701_v51  ;;  %v401_v57 = vmul.f32 0.5, %v395_v55 }
 0x112   :  { %3245 = vtanh.f32 %v3703_v52  ;;  %v400_v60 = vmul.f32 0.5, %v394_v56 }
 0x11b   :  { %v3244_v58 = vpop.eup %3243 }
 0x11c   :  { %v3246_v62 = vpop.eup %3245  ;;  %v413_v63 = vmul.f32 %v3244_v58, %v401_v57 }
 0x11d   :  { %v412_v0 = vmul.f32 %v3246_v62, %v400_v60 }
 0x11f   :  { %v3120_v3 = vpack.c.bf16 %v413_v63, %v412_v0 }
 0x121   :  { %3121 = vmatprep.subr.bf16.mxu1 %v3120_v3 }
 0x122   :  { %3123 = vmatpush3.bf16.msra.mxu1 %v3120_v3 }
 0x123   :  { %2897 = vmatprep.subr.mxu1 %v2556_v6 }
 0x125   :  { %2886 = vmatmul.mubr.msk.f32.vlgmr.msra.gmra.mrb[2].mxu1 %vm110_vm1, %v3545_v14 }
 0x126   :  { %2888 = vmatprep.mubr.msk.f32.mxu1 %vm110_vm1, %v3555_v16  ;;  %2898 = vmatpush3.msra.mxu1 %v2556_v6 }
 0x129   :  { %2889 = vmatmul.mubr.msk.f32.gmra.mrb[4].mxu1 %vm110_vm1, %v3572_v19 }
 0x12a   :  { %2891 = vmatprep.mubr.msk.f32.mxu1 %vm110_vm1, %v3577_v20 }
 0x12d   :  { %2892 = vmatmul.mubr.msk.f32.gmra.mrb[6].mxu1 %vm110_vm1, %v3594_v23 }
 0x12e   :  { %2894 = vmatprep.mubr.msk.f32.mxu1 %vm110_vm1, %v3520_v4 }
 0x131   :  { %2895 = vmatmul.mubr.msk.f32.gmra.mrb[8].mxu1 %vm110_vm1, %v3550_v15 }
 0x132   :  { %2899 = vmatprep.mubr.msk.f32.mxu1 %vm36_vm0, %v3599_v24 }
 0x135   :  { %2900 = vmatmul.mubr.msk.f32.vlgmr.msra.gmra.mrb[2].mxu1 %vm36_vm0, %v3614_v27 }
 0x136   :  { %2902 = vmatprep.mubr.msk.f32.mxu1 %vm36_vm0, %v3619_v28 }
 0x139   :  { %2903 = vmatmul.mubr.msk.f32.gmra.mrb[4].mxu1 %vm36_vm0, %v3634_v31 }
 0x13a   :  { %2905 = vmatprep.mubr.msk.f32.mxu1 %vm36_vm0, %v3639_v32 }
 0x13d   :  { %2906 = vmatmul.mubr.msk.f32.gmra.mrb[6].mxu1 %vm36_vm0, %v3654_v35 }
 0x13e   :  { %2908 = vmatprep.mubr.msk.f32.mxu1 %vm36_vm0, %v3659_v36 }
 0x141   :  { %2909 = vmatmul.mubr.msk.f32.gmra.mrb[8].mxu1 %vm36_vm0, %v3671_v39 }
 0x142   :  { %2945 = vmatprep.mubr.msk.f32.mxu1 %vm110_vm1, %v3505_v1 }
 0x208   :  { %v2901_v8 = vpop.f32.mrb[2].mxu1 }
 0x209   :  { %v627_v9 = vadd.f32 %v2901_v8, %v3681_v44  ;;  %v587_v10 = vpop.f32.mrb[3].mxu1 }
 0x20a   :  { %v626_v11 = vadd.f32 %v587_v10, %v3677_v42 }
 0x20b   :  { %v635_v12 = vmul.f32 0.5, %v627_v9 }
 0x20c   :  { %v634_v13 = vmul.f32 0.5, %v626_v11  ;;  %v2904_v17 = vpop.f32.mrb[4].mxu1 }
 0x20d   :  { %v629_v18 = vadd.f32 %v2904_v17, %v3685_v49  ;;  %v597_v21 = vpop.f32.mrb[5].mxu1  ;;  %3247 = vtanh.f32 %v635_v12 }
 0x20e   :  { %v628_v22 = vadd.f32 %v597_v21, %v3679_v43  ;;  %3249 = vtanh.f32 %v634_v13 }
 0x20f   :  { %v637_v25 = vmul.f32 0.5, %v629_v18 }
 0x210   :  { %v636_v26 = vmul.f32 0.5, %v628_v22  ;;  %v2907_v29 = vpop.f32.mrb[6].mxu1 }
 0x211   :  { %3251 = vtanh.f32 %v637_v25  ;;  %v607_v30 = vpop.f32.mrb[7].mxu1  ;;  %v631_v38 = vadd.f32 %v2907_v29, %v3693_v5 }
 0x212   :  { %3253 = vtanh.f32 %v636_v26  ;;  %v630_v41 = vadd.f32 %v607_v30, %v3696_v7 }
 0x213   :  { %v639_v47 = vmul.f32 0.5, %v631_v38 }
 0x214   :  { %v2910_v33 = vpop.f32.mrb[8].mxu1  ;;  %v638_v50 = vmul.f32 0.5, %v630_v41 }
 0x215   :  { %v633_v34 = vadd.f32 %v2910_v33, %v3689_v59  ;;  %v617_v37 = vpop.f32.mrb[9].mxu1  ;;  %v2573_v33 = vld [vmem:[%s4200_s0 + $0x10] sm:$0xff] }
 0x216   :  { %v632_v40 = vadd.f32 %v617_v37, %v3691_v61 }
 0x217   :  { %3255 = vtanh.f32 %v633_v34  ;;  %v3248_v45 = vpop.eup %3247 }
 0x218   :  { %3257 = vtanh.f32 %v632_v40  ;;  %v3250_v46 = vpop.eup %3249  ;;  %v647_v54 = vadd.f32 1.0, %v3248_v45 }
 0x219   :  { %v646_v56 = vadd.f32 1.0, %v3250_v46  ;;  %3259 = vtanh.f32 %v639_v47 }
 0x21a   :  { %3261 = vtanh.f32 %v638_v50  ;;  %v653_v62 = vmul.f32 0.5, %v647_v54 }
 0x21b   :  { %v3252_v48 = vpop.eup %3251  ;;  %v652_v0 = vmul.f32 0.5, %v646_v56 }
 0x21c   :  { %v3254_v53 = vpop.eup %3253  ;;  %v649_v55 = vadd.f32 1.0, %v3252_v48 }
 0x21d   :  { %v648_v57 = vadd.f32 1.0, %v3254_v53 }
 0x21e   :  { %v655_v58 = vmul.f32 0.5, %v649_v55 }
 0x21f   :  { %v654_v60 = vmul.f32 0.5, %v648_v57 }
 0x220   :  { %v661_v6 = vmul.f32 %v655_v58, %v3701_v51 }
 0x221   :  { %v3256_v63 = vpop.eup %3255  ;;  %v660_v9 = vmul.f32 %v654_v60, %v3703_v52 }
 0x222   :  { %v3258_v3 = vpop.eup %3257  ;;  %v663_v8 = vmul.f32 %v3256_v63, %v653_v62 }
 0x223   :  { %v662_v10 = vmul.f32 %v3258_v3, %v652_v0  ;;  %v3260_v13 = vpop.eup %3259 }
 0x224   :  { %v3752_v11 = vadd.f32 %v663_v8, %v661_v6  ;;  %v3262_v17 = vpop.eup %3261  ;;  %v651_v18 = vadd.f32 1.0, %v3260_v13 }
 0x225   :  { %v3754_v12 = vadd.f32 %v662_v10, %v660_v9  ;;  %v650_v21 = vadd.f32 1.0, %v3262_v17 }
 0x226   :  { %3263 = vtanh.f32 %v3752_v11  ;;  %v657_v22 = vmul.f32 0.5, %v651_v18 }
 0x227   :  { %3265 = vtanh.f32 %v3754_v12  ;;  %v656_v26 = vmul.f32 0.5, %v650_v21 }
 0x230   :  { %v3264_v25 = vpop.eup %3263 }
 0x231   :  { %v3266_v51 = vpop.eup %3265  ;;  %v669_v29 = vmul.f32 %v3264_v25, %v657_v22 }
 0x232   :  { %v668_v30 = vmul.f32 %v3266_v51, %v656_v26 }
 0x234   :  { %v3124_v52 = vpack.c.bf16 %v669_v29, %v668_v30 }
 0x236   :  { %3125 = vmatprep.subr.bf16.mxu0 %v3124_v52 }
 0x237   :  { %3127 = vmatpush3.bf16.msra.mxu0 %v3124_v52 }
 0x238   :  { %2927 = vmatprep.subr.mxu0 %v2573_v33 }
 0x23a   :  { %2916 = vmatmul.mubr.msk.f32.vlgmr.msra.gmra.mrb[8].mxu0 %vm110_vm1, %v3545_v14 }
 0x23b   :  { %2918 = vmatprep.mubr.msk.f32.mxu0 %vm110_vm1, %v3555_v16  ;;  %2928 = vmatpush3.msra.mxu0 %v2573_v33 }
 0x23e   :  { %2919 = vmatmul.mubr.msk.f32.gmra.mrb[10].mxu0 %vm110_vm1, %v3572_v19 }
 0x23f   :  { %2921 = vmatprep.mubr.msk.f32.mxu0 %vm110_vm1, %v3577_v20 }
 0x242   :  { %2922 = vmatmul.mubr.msk.f32.gmra.mrb[12].mxu0 %vm110_vm1, %v3594_v23 }
 0x243   :  { %2924 = vmatprep.mubr.msk.f32.mxu0 %vm110_vm1, %v3520_v4 }
 0x246   :  { %2925 = vmatmul.mubr.msk.f32.gmra.mrb[14].mxu0 %vm110_vm1, %v3550_v15 }
 0x247   :  { %2929 = vmatprep.mubr.msk.f32.mxu0 %vm36_vm0, %v3599_v24 }
 0x24a   :  { %2930 = vmatmul.mubr.msk.f32.vlgmr.msra.gmra.mrb[8].mxu0 %vm36_vm0, %v3614_v27 }
 0x24b   :  { %2932 = vmatprep.mubr.msk.f32.mxu0 %vm36_vm0, %v3619_v28 }
 0x24e   :  { %2933 = vmatmul.mubr.msk.f32.gmra.mrb[10].mxu0 %vm36_vm0, %v3634_v31 }
 0x24f   :  { %2935 = vmatprep.mubr.msk.f32.mxu0 %vm36_vm0, %v3639_v32 }
 0x252   :  { %2936 = vmatmul.mubr.msk.f32.gmra.mrb[12].mxu0 %vm36_vm0, %v3654_v35 }
 0x253   :  { %2938 = vmatprep.mubr.msk.f32.mxu0 %vm36_vm0, %v3659_v36 }
 0x256   :  { %2939 = vmatmul.mubr.msk.f32.gmra.mrb[14].mxu0 %vm36_vm0, %v3671_v39 }
 0x257   :  { %2975 = vmatprep.mubr.msk.f32.mxu0 %vm110_vm1, %v3505_v1 }
 0x31d   :  { %v2931_v34 = vpop.f32.mrb[8].mxu0 }
 0x31e   :  { %v883_v37 = vadd.f32 %v2931_v34, %v3681_v44  ;;  %v843_v38 = vpop.f32.mrb[9].mxu0 }
 0x31f   :  { %v882_v40 = vadd.f32 %v843_v38, %v3677_v42 }
 0x320   :  { %v891_v41 = vmul.f32 0.5, %v883_v37 }
 0x321   :  { %v890_v45 = vmul.f32 0.5, %v882_v40  ;;  %v2934_v46 = vpop.f32.mrb[10].mxu0 }
 0x322   :  { %v885_v47 = vadd.f32 %v2934_v46, %v3685_v49  ;;  %v853_v48 = vpop.f32.mrb[11].mxu0  ;;  %3267 = vtanh.f32 %v891_v41 }
 0x323   :  { %v884_v50 = vadd.f32 %v853_v48, %v3679_v43  ;;  %3269 = vtanh.f32 %v890_v45 }
 0x324   :  { %v893_v53 = vmul.f32 0.5, %v885_v47 }
 0x325   :  { %v892_v54 = vmul.f32 0.5, %v884_v50  ;;  %v2937_v55 = vpop.f32.mrb[12].mxu0 }
 0x326   :  { %3271 = vtanh.f32 %v893_v53  ;;  %v863_v56 = vpop.f32.mrb[13].mxu0  ;;  %v887_v62 = vadd.f32 %v2937_v55, %v3693_v5 }
 0x327   :  { %3273 = vtanh.f32 %v892_v54  ;;  %v886_v0 = vadd.f32 %v863_v56, %v3696_v7 }
 0x328   :  { %v895_v8 = vmul.f32 0.5, %v887_v62 }
 0x329   :  { %v2940_v57 = vpop.f32.mrb[14].mxu0  ;;  %v894_v10 = vmul.f32 0.5, %v886_v0 }
 0x32a   :  { %v889_v58 = vadd.f32 %v2940_v57, %v3689_v59  ;;  %v873_v60 = vpop.f32.mrb[15].mxu0  ;;  %v2590_v57 = vld [vmem:[%s4200_s0 + $0x18] sm:$0xff] }
 0x32b   :  { %v888_v63 = vadd.f32 %v873_v60, %v3691_v61 }
 0x32c   :  { %3275 = vtanh.f32 %v889_v58  ;;  %v3268_v3 = vpop.eup %3267 }
 0x32d   :  { %3277 = vtanh.f32 %v888_v63  ;;  %v3270_v6 = vpop.eup %3269  ;;  %v903_v17 = vadd.f32 1.0, %v3268_v3 }
 0x32e   :  { %v902_v21 = vadd.f32 1.0, %v3270_v6  ;;  %3279 = vtanh.f32 %v895_v8 }
 0x32f   :  { %3281 = vtanh.f32 %v894_v10  ;;  %v909_v51 = vmul.f32 0.5, %v903_v17 }
 0x330   :  { %v3272_v9 = vpop.eup %3271  ;;  %v908_v30 = vmul.f32 0.5, %v902_v21 }
 0x331   :  { %v3274_v13 = vpop.eup %3273  ;;  %v905_v18 = vadd.f32 1.0, %v3272_v9 }
 0x332   :  { %v904_v22 = vadd.f32 1.0, %v3274_v13 }
 0x333   :  { %v911_v25 = vmul.f32 0.5, %v905_v18 }
 0x334   :  { %v910_v26 = vmul.f32 0.5, %v904_v22 }
 0x335   :  { %v917_v33 = vmul.f32 %v911_v25, %v3752_v11 }
 0x336   :  { %v3276_v29 = vpop.eup %3275  ;;  %v916_v37 = vmul.f32 %v910_v26, %v3754_v12 }
 0x337   :  { %v3278_v52 = vpop.eup %3277  ;;  %v919_v34 = vmul.f32 %v3276_v29, %v909_v51 }
 0x338   :  { %v918_v38 = vmul.f32 %v3278_v52, %v908_v30  ;;  %v3280_v45 = vpop.eup %3279 }
 0x339   :  { %v3803_v40 = vadd.f32 %v919_v34, %v917_v33  ;;  %v3282_v46 = vpop.eup %3281  ;;  %v907_v47 = vadd.f32 1.0, %v3280_v45 }
 0x33a   :  { %v3805_v41 = vadd.f32 %v918_v38, %v916_v37  ;;  %v906_v48 = vadd.f32 1.0, %v3282_v46 }
 0x33b   :  { %3283 = vtanh.f32 %v3803_v40  ;;  %v913_v50 = vmul.f32 0.5, %v907_v47 }
 0x33c   :  { %3285 = vtanh.f32 %v3805_v41  ;;  %v912_v54 = vmul.f32 0.5, %v906_v48 }
 0x345   :  { %v3284_v53 = vpop.eup %3283 }
 0x346   :  { %v3286_v11 = vpop.eup %3285  ;;  %v925_v55 = vmul.f32 %v3284_v53, %v913_v50 }
 0x347   :  { %v924_v56 = vmul.f32 %v3286_v11, %v912_v54 }
 0x349   :  { %v3128_v12 = vpack.c.bf16 %v925_v55, %v924_v56 }
 0x34b   :  { %3129 = vmatprep.subr.bf16.mxu1 %v3128_v12 }
 0x34c   :  { %3131 = vmatpush3.bf16.msra.mxu1 %v3128_v12 }
 0x34d   :  { %2957 = vmatprep.subr.mxu1 %v2590_v57 }
 0x34f   :  { %2946 = vmatmul.mubr.msk.f32.vlgmr.msra.gmra.mrb[10].mxu1 %vm110_vm1, %v3545_v14 }
 0x350   :  { %2948 = vmatprep.mubr.msk.f32.mxu1 %vm110_vm1, %v3555_v16  ;;  %2958 = vmatpush3.msra.mxu1 %v2590_v57 }
 0x353   :  { %2949 = vmatmul.mubr.msk.f32.gmra.mrb[12].mxu1 %vm110_vm1, %v3572_v19 }
 0x354   :  { %2951 = vmatprep.mubr.msk.f32.mxu1 %vm110_vm1, %v3577_v20 }
 0x357   :  { %2952 = vmatmul.mubr.msk.f32.gmra.mrb[14].mxu1 %vm110_vm1, %v3594_v23 }
 0x358   :  { %2954 = vmatprep.mubr.msk.f32.mxu1 %vm110_vm1, %v3520_v4 }
 0x35b   :  { %2955 = vmatmul.mubr.msk.f32.gmra.mrb[16].mxu1 %vm110_vm1, %v3550_v15 }
 0x35c   :  { %2959 = vmatprep.mubr.msk.f32.mxu1 %vm36_vm0, %v3599_v24 }
 0x35f   :  { %2960 = vmatmul.mubr.msk.f32.vlgmr.msra.gmra.mrb[10].mxu1 %vm36_vm0, %v3614_v27 }
 0x360   :  { %2962 = vmatprep.mubr.msk.f32.mxu1 %vm36_vm0, %v3619_v28 }
 0x363   :  { %2963 = vmatmul.mubr.msk.f32.gmra.mrb[12].mxu1 %vm36_vm0, %v3634_v31 }
 0x364   :  { %2965 = vmatprep.mubr.msk.f32.mxu1 %vm36_vm0, %v3639_v32 }
 0x367   :  { %2966 = vmatmul.mubr.msk.f32.gmra.mrb[14].mxu1 %vm36_vm0, %v3654_v35 }
 0x368   :  { %2968 = vmatprep.mubr.msk.f32.mxu1 %vm36_vm0, %v3659_v36 }
 0x36b   :  { %2969 = vmatmul.mubr.msk.f32.gmra.mrb[16].mxu1 %vm36_vm0, %v3671_v39 }
 0x36c   :  { %3005 = vmatprep.mubr.msk.f32.mxu1 %vm110_vm1, %v3505_v1 }
 0x432   :  { %v2961_v58 = vpop.f32.mrb[10].mxu1 }
 0x433   :  { %v1139_v60 = vadd.f32 %v2961_v58, %v3681_v44  ;;  %v1099_v62 = vpop.f32.mrb[11].mxu1 }
 0x434   :  { %v1138_v63 = vadd.f32 %v1099_v62, %v3677_v42 }
 0x435   :  { %v1147_v0 = vmul.f32 0.5, %v1139_v60 }
 0x436   :  { %v1146_v3 = vmul.f32 0.5, %v1138_v63  ;;  %v2964_v6 = vpop.f32.mrb[12].mxu1 }
 0x437   :  { %v1141_v8 = vadd.f32 %v2964_v6, %v3685_v49  ;;  %v1109_v9 = vpop.f32.mrb[13].mxu1  ;;  %3287 = vtanh.f32 %v1147_v0 }
 0x438   :  { %v1140_v10 = vadd.f32 %v1109_v9, %v3679_v43  ;;  %3289 = vtanh.f32 %v1146_v3 }
 0x439   :  { %v1149_v13 = vmul.f32 0.5, %v1141_v8 }
 0x43a   :  { %v1148_v17 = vmul.f32 0.5, %v1140_v10  ;;  %v2967_v18 = vpop.f32.mrb[14].mxu1 }
 0x43b   :  { %3291 = vtanh.f32 %v1149_v13  ;;  %v1119_v21 = vpop.f32.mrb[15].mxu1  ;;  %v1143_v51 = vadd.f32 %v2967_v18, %v3693_v5 }
 0x43c   :  { %3293 = vtanh.f32 %v1148_v17  ;;  %v1142_v30 = vadd.f32 %v1119_v21, %v3696_v7 }
 0x43d   :  { %v1151_v34 = vmul.f32 0.5, %v1143_v51 }
 0x43e   :  { %v2970_v22 = vpop.f32.mrb[16].mxu1  ;;  %v1150_v38 = vmul.f32 0.5, %v1142_v30 }
 0x43f   :  { %v1145_v25 = vadd.f32 %v2970_v22, %v3689_v59  ;;  %v1129_v26 = vpop.f32.mrb[17].mxu1  ;;  %v2607_v22 = vld [vmem:[%s4200_s0 + $0x20] sm:$0xff] }
 0x440   :  { %v1144_v29 = vadd.f32 %v1129_v26, %v3691_v61 }
 0x441   :  { %3295 = vtanh.f32 %v1145_v25  ;;  %v3288_v52 = vpop.eup %3287 }
 0x442   :  { %3297 = vtanh.f32 %v1144_v29  ;;  %v3290_v33 = vpop.eup %3289  ;;  %v1159_v46 = vadd.f32 1.0, %v3288_v52 }
 0x443   :  { %v1158_v48 = vadd.f32 1.0, %v3290_v33  ;;  %3299 = vtanh.f32 %v1151_v34 }
 0x444   :  { %3301 = vtanh.f32 %v1150_v38  ;;  %v1165_v11 = vmul.f32 0.5, %v1159_v46 }
 0x445   :  { %v3292_v37 = vpop.eup %3291  ;;  %v1164_v56 = vmul.f32 0.5, %v1158_v48 }
 0x446   :  { %v3294_v45 = vpop.eup %3293  ;;  %v1161_v47 = vadd.f32 1.0, %v3292_v37 }
 0x447   :  { %v1160_v50 = vadd.f32 1.0, %v3294_v45 }
 0x448   :  { %v1167_v53 = vmul.f32 0.5, %v1161_v47 }
 0x449   :  { %v1166_v54 = vmul.f32 0.5, %v1160_v50 }
 0x44a   :  { %v1173_v57 = vmul.f32 %v1167_v53, %v3803_v40 }
 0x44b   :  { %v3296_v55 = vpop.eup %3295  ;;  %v1172_v60 = vmul.f32 %v1166_v54, %v3805_v41 }
 0x44c   :  { %v3298_v12 = vpop.eup %3297  ;;  %v1175_v58 = vmul.f32 %v3296_v55, %v1165_v11 }
 0x44d   :  { %v1174_v62 = vmul.f32 %v3298_v12, %v1164_v56  ;;  %v3300_v3 = vpop.eup %3299 }
 0x44e   :  { %v3854_v63 = vadd.f32 %v1175_v58, %v1173_v57  ;;  %v3302_v6 = vpop.eup %3301  ;;  %v1163_v8 = vadd.f32 1.0, %v3300_v3 }
 0x44f   :  { %v3856_v0 = vadd.f32 %v1174_v62, %v1172_v60  ;;  %v1162_v9 = vadd.f32 1.0, %v3302_v6 }
 0x450   :  { %3303 = vtanh.f32 %v3854_v63  ;;  %v1169_v10 = vmul.f32 0.5, %v1163_v8 }
 0x451   :  { %3305 = vtanh.f32 %v3856_v0  ;;  %v1168_v17 = vmul.f32 0.5, %v1162_v9 }
 0x45a   :  { %v3304_v13 = vpop.eup %3303 }
 0x45b   :  { %v3306_v40 = vpop.eup %3305  ;;  %v1181_v18 = vmul.f32 %v3304_v13, %v1169_v10 }
 0x45c   :  { %v1180_v21 = vmul.f32 %v3306_v40, %v1168_v17 }
 0x45e   :  { %v3132_v41 = vpack.c.bf16 %v1181_v18, %v1180_v21 }
 0x460   :  { %3133 = vmatprep.subr.bf16.mxu0 %v3132_v41 }
 0x461   :  { %3135 = vmatpush3.bf16.msra.mxu0 %v3132_v41 }
 0x462   :  { %2987 = vmatprep.subr.mxu0 %v2607_v22 }
 0x464   :  { %2976 = vmatmul.mubr.msk.f32.vlgmr.msra.gmra.mrb[16].mxu0 %vm110_vm1, %v3545_v14 }
 0x465   :  { %2978 = vmatprep.mubr.msk.f32.mxu0 %vm110_vm1, %v3555_v16  ;;  %2988 = vmatpush3.msra.mxu0 %v2607_v22 }
 0x468   :  { %2979 = vmatmul.mubr.msk.f32.gmra.mrb[18].mxu0 %vm110_vm1, %v3572_v19 }
 0x469   :  { %2981 = vmatprep.mubr.msk.f32.mxu0 %vm110_vm1, %v3577_v20 }
 0x46c   :  { %2982 = vmatmul.mubr.msk.f32.gmra.mrb[20].mxu0 %vm110_vm1, %v3594_v23 }
 0x46d   :  { %2984 = vmatprep.mubr.msk.f32.mxu0 %vm110_vm1, %v3520_v4 }
 0x470   :  { %2985 = vmatmul.mubr.msk.f32.gmra.mrb[22].mxu0 %vm110_vm1, %v3550_v15 }
 0x471   :  { %2989 = vmatprep.mubr.msk.f32.mxu0 %vm36_vm0, %v3599_v24 }
 0x474   :  { %2990 = vmatmul.mubr.msk.f32.vlgmr.msra.gmra.mrb[16].mxu0 %vm36_vm0, %v3614_v27 }
 0x475   :  { %2992 = vmatprep.mubr.msk.f32.mxu0 %vm36_vm0, %v3619_v28 }
 0x478   :  { %2993 = vmatmul.mubr.msk.f32.gmra.mrb[18].mxu0 %vm36_vm0, %v3634_v31 }
 0x479   :  { %2995 = vmatprep.mubr.msk.f32.mxu0 %vm36_vm0, %v3639_v32 }
 0x47c   :  { %2996 = vmatmul.mubr.msk.f32.gmra.mrb[20].mxu0 %vm36_vm0, %v3654_v35 }
 0x47d   :  { %2998 = vmatprep.mubr.msk.f32.mxu0 %vm36_vm0, %v3659_v36 }
 0x480   :  { %2999 = vmatmul.mubr.msk.f32.gmra.mrb[22].mxu0 %vm36_vm0, %v3671_v39 }
 0x481   :  { %3035 = vmatprep.mubr.msk.f32.mxu0 %vm110_vm1, %v3505_v1 }
 0x547   :  { %v2991_v25 = vpop.f32.mrb[16].mxu0 }
 0x548   :  { %v1395_v26 = vadd.f32 %v2991_v25, %v3681_v44  ;;  %v1355_v51 = vpop.f32.mrb[17].mxu0 }
 0x549   :  { %v1394_v29 = vadd.f32 %v1355_v51, %v3677_v42 }
 0x54a   :  { %v1403_v30 = vmul.f32 0.5, %v1395_v26 }
 0x54b   :  { %v1402_v52 = vmul.f32 0.5, %v1394_v29  ;;  %v2994_v33 = vpop.f32.mrb[18].mxu0 }
 0x54c   :  { %v1397_v34 = vadd.f32 %v2994_v33, %v3685_v49  ;;  %v1365_v37 = vpop.f32.mrb[19].mxu0  ;;  %3307 = vtanh.f32 %v1403_v30 }
 0x54d   :  { %v1396_v38 = vadd.f32 %v1365_v37, %v3679_v43  ;;  %3309 = vtanh.f32 %v1402_v52 }
 0x54e   :  { %v1405_v45 = vmul.f32 0.5, %v1397_v34 }
 0x54f   :  { %v1404_v46 = vmul.f32 0.5, %v1396_v38  ;;  %v2997_v47 = vpop.f32.mrb[20].mxu0 }
 0x550   :  { %3311 = vtanh.f32 %v1405_v45  ;;  %v1375_v1 = vpop.f32.mrb[21].mxu0  ;;  %v1399_v54 = vadd.f32 %v2997_v47, %v3693_v5 }
 0x551   :  { %3313 = vtanh.f32 %v1404_v46  ;;  %v1398_v55 = vadd.f32 %v1375_v1, %v3696_v7  ;;  %v2624_v1 = vld [vmem:[%s4200_s0 + $0x28] sm:$0xff] }
 0x552   :  { %v1407_v57 = vmul.f32 0.5, %v1399_v54 }
 0x553   :  { %v3000_v48 = vpop.f32.mrb[22].mxu0  ;;  %v1406_v60 = vmul.f32 0.5, %v1398_v55 }
 0x554   :  { %v1401_v50 = vadd.f32 %v3000_v48, %v3689_v59  ;;  %v1385_v53 = vpop.f32.mrb[23].mxu0 }
 0x555   :  { %v1400_v11 = vadd.f32 %v1385_v53, %v3691_v61 }
 0x556   :  { %3315 = vtanh.f32 %v1401_v50  ;;  %v3308_v56 = vpop.eup %3307 }
 0x557   :  { %3317 = vtanh.f32 %v1400_v11  ;;  %v3310_v12 = vpop.eup %3309  ;;  %v1415_v3 = vadd.f32 1.0, %v3308_v56 }
 0x558   :  { %v1414_v8 = vadd.f32 1.0, %v3310_v12  ;;  %3319 = vtanh.f32 %v1407_v57 }
 0x559   :  { %3321 = vtanh.f32 %v1406_v60  ;;  %v1421_v17 = vmul.f32 0.5, %v1415_v3 }
 0x55a   :  { %v3312_v58 = vpop.eup %3311  ;;  %v1420_v18 = vmul.f32 0.5, %v1414_v8 }
 0x55b   :  { %v3314_v62 = vpop.eup %3313  ;;  %v1417_v6 = vadd.f32 1.0, %v3312_v58 }
 0x55c   :  { %v1416_v9 = vadd.f32 1.0, %v3314_v62 }
 0x55d   :  { %v1423_v10 = vmul.f32 0.5, %v1417_v6 }
 0x55e   :  { %v1422_v13 = vmul.f32 0.5, %v1416_v9 }
 0x55f   :  { %v1429_v41 = vmul.f32 %v1423_v10, %v3854_v63 }
 0x560   :  { %v3316_v40 = vpop.eup %3315  ;;  %v1428_v25 = vmul.f32 %v1422_v13, %v3856_v0 }
 0x561   :  { %v3318_v21 = vpop.eup %3317  ;;  %v1431_v22 = vmul.f32 %v3316_v40, %v1421_v17 }
 0x562   :  { %v1430_v26 = vmul.f32 %v3318_v21, %v1420_v18  ;;  %v3320_v30 = vpop.eup %3319 }
 0x563   :  { %v3905_v51 = vadd.f32 %v1431_v22, %v1429_v41  ;;  %v3322_v52 = vpop.eup %3321  ;;  %v1419_v33 = vadd.f32 1.0, %v3320_v30 }
 0x564   :  { %v3907_v29 = vadd.f32 %v1430_v26, %v1428_v25  ;;  %v1418_v34 = vadd.f32 1.0, %v3322_v52 }
 0x565   :  { %3323 = vtanh.f32 %v3905_v51  ;;  %v1425_v37 = vmul.f32 0.5, %v1419_v33 }
 0x566   :  { %3325 = vtanh.f32 %v3907_v29  ;;  %v1424_v45 = vmul.f32 0.5, %v1418_v34 }
 0x56f   :  { %v3324_v38 = vpop.eup %3323 }
 0x570   :  { %v3326_v63 = vpop.eup %3325  ;;  %v1437_v46 = vmul.f32 %v3324_v38, %v1425_v37 }
 0x571   :  { %v1436_v47 = vmul.f32 %v3326_v63, %v1424_v45 }
 0x573   :  { %v3136_v0 = vpack.c.bf16 %v1437_v46, %v1436_v47 }
 0x575   :  { %3137 = vmatprep.subr.bf16.mxu1 %v3136_v0 }
 0x576   :  { %3139 = vmatpush3.bf16.msra.mxu1 %v3136_v0 }
 0x577   :  { %3017 = vmatprep.subr.mxu1 %v2624_v1 }
 0x579   :  { %3006 = vmatmul.mubr.msk.f32.vlgmr.msra.gmra.mrb[18].mxu1 %vm110_vm1, %v3545_v14 }
 0x57a   :  { %3008 = vmatprep.mubr.msk.f32.mxu1 %vm110_vm1, %v3555_v16  ;;  %3018 = vmatpush3.msra.mxu1 %v2624_v1  ;;  %v2641_v1 = vld [vmem:[%s4200_s0 + $0x30] sm:$0xff] }
 0x57d   :  { %3009 = vmatmul.mubr.msk.f32.gmra.mrb[20].mxu1 %vm110_vm1, %v3572_v19 }
 0x57e   :  { %3011 = vmatprep.mubr.msk.f32.mxu1 %vm110_vm1, %v3577_v20 }
 0x581   :  { %3012 = vmatmul.mubr.msk.f32.gmra.mrb[22].mxu1 %vm110_vm1, %v3594_v23 }
 0x582   :  { %3014 = vmatprep.mubr.msk.f32.mxu1 %vm110_vm1, %v3520_v4  ;;  %v3409_v4 = vld [vmem:[%s4202_s2] sm:$0xff] }
 0x585   :  { %3015 = vmatmul.mubr.msk.f32.gmra.mrb[24].mxu1 %vm110_vm1, %v3550_v15 }
 0x586   :  { %3019 = vmatprep.mubr.msk.f32.mxu1 %vm36_vm0, %v3599_v24 }
 0x589   :  { %3020 = vmatmul.mubr.msk.f32.vlgmr.msra.gmra.mrb[18].mxu1 %vm36_vm0, %v3614_v27 }
 0x58a   :  { %3022 = vmatprep.mubr.msk.f32.mxu1 %vm36_vm0, %v3619_v28 }
 0x58d   :  { %3023 = vmatmul.mubr.msk.f32.gmra.mrb[20].mxu1 %vm36_vm0, %v3634_v31 }
 0x58e   :  { %3025 = vmatprep.mubr.msk.f32.mxu1 %vm36_vm0, %v3639_v32 }
 0x591   :  { %3026 = vmatmul.mubr.msk.f32.gmra.mrb[22].mxu1 %vm36_vm0, %v3654_v35 }
 0x592   :  { %3028 = vmatprep.mubr.msk.f32.mxu1 %vm36_vm0, %v3659_v36 }
 0x595   :  { %3029 = vmatmul.mubr.msk.f32.gmra.mrb[24].mxu1 %vm36_vm0, %v3671_v39 }
 0x596   :  { %3065 = vmatprep.mubr.msk.f32.mxu1 %vm110_vm1, %v3409_v4  ;;  %v3970_v4 = vld [vmem:[%s4200_s0 + $0x38] sm:$0xff] }
 0x65c   :  { %v3021_v14 = vpop.f32.mrb[18].mxu1 }
 0x65d   :  { %v1651_v15 = vadd.f32 %v3021_v14, %v3681_v44  ;;  %v1611_v16 = vpop.f32.mrb[19].mxu1  ;;  %v3975_v14 = vld [vmem:[%s4202_s2 + $0x8] sm:$0xff] }
 0x65e   :  { %v1650_v19 = vadd.f32 %v1611_v16, %v3677_v42  ;;  %v3990_v16 = vld [vmem:[%s4202_s2 + $0x18] sm:$0xff] }
 0x65f   :  { %v1659_v20 = vmul.f32 0.5, %v1651_v15  ;;  %v3982_v15 = vld [vmem:[%s4202_s2 + $0x10] sm:$0xff] }
 0x660   :  { %v1658_v23 = vmul.f32 0.5, %v1650_v19  ;;  %v3024_v24 = vpop.f32.mrb[20].mxu1  ;;  %v3997_v19 = vld [vmem:[%s4202_s2 + $0x20] sm:$0xff] }
 0x661   :  { %v1653_v27 = vadd.f32 %v3024_v24, %v3685_v49  ;;  %v1621_v28 = vpop.f32.mrb[21].mxu1  ;;  %3327 = vtanh.f32 %v1659_v20  ;;  %v4004_v20 = vld [vmem:[%s4202_s2 + $0x28] sm:$0xff]  ;;  %v4018_v24 = vld [vmem:[%s4202_s2 + $0x38] sm:$0xff] }
 0x662   :  { %v1652_v31 = vadd.f32 %v1621_v28, %v3679_v43  ;;  %3329 = vtanh.f32 %v1658_v23  ;;  %v4011_v23 = vld [vmem:[%s4202_s2 + $0x30] sm:$0xff]  ;;  %v4032_v28 = vld [vmem:[%s4201_s1 + $0x8] sm:$0xff] }
 0x663   :  { %v1661_v32 = vmul.f32 0.5, %v1653_v27  ;;  %v4025_v27 = vld [vmem:[%s4201_s1] sm:$0xff] }
 0x664   :  { %v1660_v35 = vmul.f32 0.5, %v1652_v31  ;;  %v3027_v36 = vpop.f32.mrb[22].mxu1  ;;  %v4039_v31 = vld [vmem:[%s4201_s1 + $0x10] sm:$0xff] }
 0x665   :  { %3331 = vtanh.f32 %v1661_v32  ;;  %v1631_v39 = vpop.f32.mrb[23].mxu1  ;;  %v1655_v54 = vadd.f32 %v3027_v36, %v3693_v5  ;;  %v4047_v32 = vld [vmem:[%s4201_s1 + $0x18] sm:$0xff]  ;;  %v4061_v36 = vld [vmem:[%s4201_s1 + $0x28] sm:$0xff] }
 0x666   :  { %3333 = vtanh.f32 %v1660_v35  ;;  %v1654_v55 = vadd.f32 %v1631_v39, %v3696_v7  ;;  %v4054_v35 = vld [vmem:[%s4201_s1 + $0x20] sm:$0xff]  ;;  %v4068_v39 = vld [vmem:[%s4201_s1 + $0x30] sm:$0xff] }
 0x667   :  { %v1663_v57 = vmul.f32 0.5, %v1655_v54  ;;  %v2215_v54 = vld [vmem:[%s4204_s4 + $0x10] sm:$0xff] }
 0x668   :  { %v3030_v48 = vpop.f32.mrb[24].mxu1  ;;  %v1662_v60 = vmul.f32 0.5, %v1654_v55  ;;  %v2217_v55 = vld [vmem:[%s4204_s4 + $0x20] sm:$0xff] }
 0x669   :  { %v1657_v50 = vadd.f32 %v3030_v48, %v3689_v59  ;;  %v1641_v53 = vpop.f32.mrb[25].mxu1  ;;  %v2213_v48 = vld [vmem:[%s4204_s4] sm:$0xff] }
 0x66a   :  { %v1656_v11 = vadd.f32 %v1641_v53, %v3691_v61  ;;  %v2214_v53 = vld [vmem:[%s4204_s4 + $0x8] sm:$0xff] }
 0x66b   :  { %3335 = vtanh.f32 %v1657_v50  ;;  %v3328_v56 = vpop.eup %3327  ;;  %v4078_v50 = vld [vmem:[%s4201_s1 + $0x38] sm:$0xff] }
 0x66c   :  { %3337 = vtanh.f32 %v1656_v11  ;;  %v3330_v12 = vpop.eup %3329  ;;  %v1671_v3 = vadd.f32 1.0, %v3328_v56  ;;  %v2216_v11 = vld [vmem:[%s4204_s4 + $0x18] sm:$0xff]  ;;  %v2218_v56 = vld [vmem:[%s4204_s4 + $0x28] sm:$0xff] }
 0x66d   :  { %v1670_v8 = vadd.f32 1.0, %v3330_v12  ;;  %3339 = vtanh.f32 %v1663_v57  ;;  %v2219_v12 = vld [vmem:[%s4204_s4 + $0x30] sm:$0xff]  ;;  %v2220_v57 = vld [vmem:[%s4204_s4 + $0x38] sm:$0xff] }
 0x66e   :  { %3341 = vtanh.f32 %v1662_v60  ;;  %v1677_v17 = vmul.f32 0.5, %v1671_v3 }
 0x66f   :  { %v3332_v58 = vpop.eup %3331  ;;  %v1676_v18 = vmul.f32 0.5, %v1670_v8 }
 0x670   :  { %v3334_v62 = vpop.eup %3333  ;;  %v1673_v6 = vadd.f32 1.0, %v3332_v58 }
 0x671   :  { %v1672_v9 = vadd.f32 1.0, %v3334_v62 }
 0x672   :  { %v1679_v10 = vmul.f32 0.5, %v1673_v6 }
 0x673   :  { %v1678_v13 = vmul.f32 0.5, %v1672_v9 }
 0x674   :  { %v1685_v41 = vmul.f32 %v1679_v10, %v3905_v51 }
 0x675   :  { %v3336_v40 = vpop.eup %3335  ;;  %v1684_v25 = vmul.f32 %v1678_v13, %v3907_v29 }
 0x676   :  { %v3338_v21 = vpop.eup %3337  ;;  %v1687_v22 = vmul.f32 %v3336_v40, %v1677_v17 }
 0x677   :  { %v1686_v26 = vmul.f32 %v3338_v21, %v1676_v18  ;;  %v3340_v33 = vpop.eup %3339 }
 0x678   :  { %v3958_v30 = vadd.f32 %v1687_v22, %v1685_v41  ;;  %v3342_v34 = vpop.eup %3341  ;;  %v1675_v37 = vadd.f32 1.0, %v3340_v33 }
 0x679   :  { %v3960_v52 = vadd.f32 %v1686_v26, %v1684_v25  ;;  %v1674_v38 = vadd.f32 1.0, %v3342_v34  ;;  %v2238_v25 = vpop.permute.xlu1 %2237 }
 0x67a   :  { %3343 = vtanh.f32 %v3958_v30  ;;  %v1681_v45 = vmul.f32 0.5, %v1675_v37  ;;  %v2233_v37 = vpop.permute.xlu0 %2232 }
 0x67b   :  { %3345 = vtanh.f32 %v3960_v52  ;;  %v1680_v46 = vmul.f32 0.5, %v1674_v38 }
 0x684   :  { %v3344_v63 = vpop.eup %3343 }
 0x685   :  { %v3346_v51 = vpop.eup %3345  ;;  %v1693_v47 = vmul.f32 %v3344_v63, %v1681_v45 }
 0x686   :  { %v1692_v0 = vmul.f32 %v3346_v51, %v1680_v46 }
 0x688   :  { %v3140_v29 = vpack.c.bf16 %v1693_v47, %v1692_v0 }
 0x68a   :  { %3141 = vmatprep.subr.bf16.mxu0 %v3140_v29 }
 0x68b   :  { %3143 = vmatpush3.bf16.msra.mxu0 %v3140_v29 }
 0x68c   :  { %3047 = vmatprep.subr.mxu0 %v2641_v1 }
 0x68e   :  { %3036 = vmatmul.mubr.msk.f32.vlgmr.msra.gmra.mrb[24].mxu0 %vm110_vm1, %v3975_v14 }
 0x68f   :  { %3038 = vmatprep.mubr.msk.f32.mxu0 %vm110_vm1, %v3982_v15  ;;  %3048 = vmatpush3.msra.mxu0 %v2641_v1 }
 0x690   :  { %3091 = vmatprep.subr.mxu0 %v3970_v4 }
 0x692   :  { %3039 = vmatmul.mubr.msk.f32.gmra.mrb[26].mxu0 %vm110_vm1, %v3990_v16 }
 0x693   :  { %3041 = vmatprep.mubr.msk.f32.mxu0 %vm110_vm1, %v3997_v19 }
 0x696   :  { %3042 = vmatmul.mubr.msk.f32.gmra.mrb[28].mxu0 %vm110_vm1, %v4004_v20 }
 0x697   :  { %3044 = vmatprep.mubr.msk.f32.mxu0 %vm110_vm1, %v4011_v23 }
 0x69a   :  { %3045 = vmatmul.mubr.msk.f32.gmra.mrb[30].mxu0 %vm110_vm1, %v4018_v24 }
 0x69b   :  { %3049 = vmatprep.mubr.msk.f32.mxu0 %vm36_vm0, %v4025_v27 }
 0x69e   :  { %3050 = vmatmul.mubr.msk.f32.vlgmr.msra.gmra.mrb[24].mxu0 %vm36_vm0, %v4032_v28 }
 0x69f   :  { %3052 = vmatprep.mubr.msk.f32.mxu0 %vm36_vm0, %v4039_v31  ;;  %3092 = vmatpush3.msra.mxu0 %v3970_v4 }
 0x6a2   :  { %3053 = vmatmul.mubr.msk.f32.gmra.mrb[26].mxu0 %vm36_vm0, %v4047_v32 }
 0x6a3   :  { %3055 = vmatprep.mubr.msk.f32.mxu0 %vm36_vm0, %v4054_v35 }
 0x6a6   :  { %3056 = vmatmul.mubr.msk.f32.gmra.mrb[28].mxu0 %vm36_vm0, %v4061_v36 }
 0x6a7   :  { %3058 = vmatprep.mubr.msk.f32.mxu0 %vm36_vm0, %v4068_v39 }
 0x6aa   :  { %3059 = vmatmul.mubr.msk.f32.gmra.mrb[30].mxu0 %vm36_vm0, %v4078_v50 }
 0x6ab   :  { %3093 = vmatprep.mubr.msk.f32.mxu0 %vm36_vm0, %v2213_v48 }
 0x6ae   :  { %3094 = vmatmul.mubr.msk.f32.vlgmr.msra.gmra.mrb[32].mxu0 %vm36_vm0, %v2214_v53 }
 0x6af   :  { %3096 = vmatprep.mubr.msk.f32.mxu0 %vm36_vm0, %v2215_v54  ;;  %v2248_v54 = vpop.permute.xlu1 %2247 }
 0x6b2   :  { %3097 = vmatmul.mubr.msk.f32.gmra.mrb[34].mxu0 %vm36_vm0, %v2216_v11 }
 0x6b3   :  { %3099 = vmatprep.mubr.msk.f32.mxu0 %vm36_vm0, %v2217_v55 }
 0x6b6   :  { %3100 = vmatmul.mubr.msk.f32.gmra.mrb[36].mxu0 %vm36_vm0, %v2218_v56  ;;  %v2243_v56 = vpop.permute.xlu0 %2242 }
 0x6b7   :  { %3102 = vmatprep.mubr.msk.f32.mxu0 %vm36_vm0, %v2219_v12 }
 0x6ba   :  { %3103 = vmatmul.mubr.msk.f32.gmra.mrb[38].mxu0 %vm36_vm0, %v2220_v57 }
 0x771   :  { %v3051_v58 = vpop.f32.mrb[24].mxu0 }
 0x772   :  { %v1907_v60 = vadd.f32 %v3051_v58, %v3681_v44  ;;  %v1867_v62 = vpop.f32.mrb[25].mxu0 }
 0x773   :  { %v1906_v3 = vadd.f32 %v1867_v62, %v3677_v42 }
 0x774   :  { %v1915_v6 = vmul.f32 0.5, %v1907_v60 }
 0x775   :  { %v1914_v8 = vmul.f32 0.5, %v1906_v3  ;;  %v3054_v9 = vpop.f32.mrb[26].mxu0 }
 0x776   :  { %v1909_v10 = vadd.f32 %v3054_v9, %v3685_v49  ;;  %v1877_v13 = vpop.f32.mrb[27].mxu0  ;;  %3347 = vtanh.f32 %v1915_v6 }
 0x777   :  { %v1908_v17 = vadd.f32 %v1877_v13, %v3679_v43  ;;  %3349 = vtanh.f32 %v1914_v8 }
 0x778   :  { %v1917_v40 = vmul.f32 0.5, %v1909_v10 }
 0x779   :  { %v1916_v18 = vmul.f32 0.5, %v1908_v17  ;;  %v3057_v21 = vpop.f32.mrb[28].mxu0 }
 0x77a   :  { %3351 = vtanh.f32 %v1917_v40  ;;  %v1887_v41 = vpop.f32.mrb[29].mxu0  ;;  %v1911_v26 = vadd.f32 %v3057_v21, %v3693_v5 }
 0x77b   :  { %3353 = vtanh.f32 %v1916_v18  ;;  %v1910_v38 = vadd.f32 %v1887_v41, %v3696_v7 }
 0x77c   :  { %v1919_v51 = vmul.f32 0.5, %v1911_v26 }
 0x77d   :  { %v3060_v22 = vpop.f32.mrb[30].mxu0  ;;  %v1918_v1 = vmul.f32 0.5, %v1910_v38 }
 0x77e   :  { %v1913_v33 = vadd.f32 %v3060_v22, %v3689_v59  ;;  %v1897_v34 = vpop.f32.mrb[31].mxu0  ;;  %v2268_v22 = vpop.permute.xlu1 %2267 }
 0x77f   :  { %v1912_v45 = vadd.f32 %v1897_v34, %v3691_v61  ;;  %v2263_v34 = vpop.permute.xlu0 %2262 }
 0x780   :  { %3355 = vtanh.f32 %v1913_v33  ;;  %v3348_v46 = vpop.eup %3347 }
 0x781   :  { %3357 = vtanh.f32 %v1912_v45  ;;  %v3095_v63 = vpop.f32.mrb[32].mxu0  ;;  %v3350_v29 = vpop.eup %3349  ;;  %v1927_v12 = vadd.f32 1.0, %v3348_v46 }
 0x782   :  { %v2366_v47 = vadd.f32 %v3095_v63, %v2238_v25  ;;  %v2360_v0 = vpop.f32.mrb[33].mxu0  ;;  %v1926_v62 = vadd.f32 1.0, %v3350_v29  ;;  %3359 = vtanh.f32 %v1919_v51 }
 0x783   :  { %v2361_v48 = vadd.f32 %v2360_v0, %v2233_v37  ;;  %3361 = vtanh.f32 %v1918_v1  ;;  %v1933_v40 = vmul.f32 0.5, %v1927_v12 }
 0x784   :  { %v3352_v53 = vpop.eup %3351  ;;  %v2400_v11 = vmul.f32 0.5, %v2366_v47  ;;  %v1932_v25 = vmul.f32 0.5, %v1926_v62 }
 0x785   :  { %v3354_v55 = vpop.eup %3353  ;;  %v1929_v57 = vadd.f32 1.0, %v3352_v53  ;;  %v2399_v58 = vmul.f32 0.5, %v2361_v48  ;;  %v3098_v60 = vpop.f32.mrb[34].mxu0 }
 0x786   :  { %v1928_v3 = vadd.f32 1.0, %v3354_v55  ;;  %v2376_v6 = vadd.f32 %v3098_v60, %v2248_v54  ;;  %v2370_v8 = vpop.f32.mrb[35].mxu0  ;;  %3363 = vtanh.f32 %v2400_v11  ;;  %v2258_v53 = vpop.permute.xlu1 %2257 }
 0x787   :  { %v1935_v9 = vmul.f32 0.5, %v1929_v57  ;;  %v2371_v10 = vadd.f32 %v2370_v8, %v2243_v56  ;;  %3365 = vtanh.f32 %v2399_v58  ;;  %v2253_v54 = vpop.permute.xlu0 %2252 }
 0x788   :  { %v1934_v13 = vmul.f32 0.5, %v1928_v3  ;;  %v2402_v17 = vmul.f32 0.5, %v2376_v6 }
 0x789   :  { %v2401_v18 = vmul.f32 0.5, %v2371_v10  ;;  %v3101_v21 = vpop.f32.mrb[36].mxu0  ;;  %v1941_v37 = vmul.f32 %v1935_v9, %v3958_v30 }
 0x78a   :  { %v3356_v41 = vpop.eup %3355  ;;  %3367 = vtanh.f32 %v2402_v17  ;;  %v2380_v26 = vpop.f32.mrb[37].mxu0  ;;  %v1940_v45 = vmul.f32 %v1934_v13, %v3960_v52  ;;  %v2386_v11 = vadd.f32 %v3101_v21, %v2258_v53 }
 0x78b   :  { %v3358_v33 = vpop.eup %3357  ;;  %v1943_v38 = vmul.f32 %v3356_v41, %v1933_v40  ;;  %3369 = vtanh.f32 %v2401_v18  ;;  %v2381_v52 = vadd.f32 %v2380_v26, %v2253_v54 }
 0x78c   :  { %v1942_v63 = vmul.f32 %v3358_v33, %v1932_v25  ;;  %v3360_v48 = vpop.eup %3359  ;;  %v2404_v3 = vmul.f32 0.5, %v2386_v11 }
 0x78d   :  { %v4121_v46 = vadd.f32 %v1943_v38, %v1941_v37  ;;  %v3104_v51 = vpop.f32.mrb[38].mxu0  ;;  %v3362_v30 = vpop.eup %3361  ;;  %v1931_v57 = vadd.f32 1.0, %v3360_v48  ;;  %v2403_v8 = vmul.f32 0.5, %v2381_v52 }
 0x78e   :  { %v4123_v47 = vadd.f32 %v1942_v63, %v1940_v45  ;;  %v2396_v0 = vadd.f32 %v3104_v51, %v2268_v22  ;;  %v2390_v29 = vpop.f32.mrb[39].mxu0  ;;  %v1930_v60 = vadd.f32 1.0, %v3362_v30 }
 0x78f   :  { %3371 = vtanh.f32 %v4121_v46  ;;  %v2391_v1 = vadd.f32 %v2390_v29, %v2263_v34  ;;  %v1937_v10 = vmul.f32 0.5, %v1931_v57 }
 0x790   :  { %3373 = vtanh.f32 %v4123_v47  ;;  %v3364_v55 = vpop.eup %3363  ;;  %v1936_v40 = vmul.f32 0.5, %v1930_v60 }
 0x791   :  { %3375 = vtanh.f32 %v2396_v0  ;;  %v3366_v56 = vpop.eup %3365  ;;  %v2412_v9 = vadd.f32 1.0, %v3364_v55 }
 0x792   :  { %3377 = vtanh.f32 %v2391_v1  ;;  %v2411_v13 = vadd.f32 1.0, %v3366_v56 }
 0x793   :  { %3379 = vtanh.f32 %v2404_v3  ;;  %v2418_v25 = vmul.f32 0.5, %v2412_v9 }
 0x794   :  { %v3368_v12 = vpop.eup %3367  ;;  %3381 = vtanh.f32 %v2403_v8  ;;  %v2417_v34 = vmul.f32 0.5, %v2411_v13 }
 0x795   :  { %v3370_v58 = vpop.eup %3369  ;;  %v2414_v62 = vadd.f32 1.0, %v3368_v12 }
 0x796   :  { %v2413_v6 = vadd.f32 1.0, %v3370_v58 }
 0x797   :  { %v2420_v18 = vmul.f32 0.5, %v2414_v62 }
 0x798   :  { %v2419_v41 = vmul.f32 0.5, %v2413_v6 }
 0x799   :  { %v3372_v17 = vpop.eup %3371  ;;  %v2426_v38 = vmul.f32 0.0, %v2420_v18 }
 0x79a   :  { %v3374_v21 = vpop.eup %3373  ;;  %v1949_v22 = vmul.f32 %v3372_v17, %v1937_v10  ;;  %v2425_v51 = vmul.f32 0.0, %v2419_v41 }
 0x79b   :  { %v1948_v26 = vmul.f32 %v3374_v21, %v1936_v40  ;;  %v3376_v33 = vpop.eup %3375 }
 0x79c   :  { %v3378_v37 = vpop.eup %3377  ;;  %v2428_v45 = vmul.f32 %v3376_v33, %v2418_v25 }
 0x79d   :  { %v3144_v63 = vpack.c.bf16 %v1949_v22, %v1948_v26  ;;  %v2427_v0 = vmul.f32 %v3378_v37, %v2417_v34  ;;  %v3380_v48 = vpop.eup %3379 }
 0x79e   :  { %v2430_v29 = vadd.f32 %v2428_v45, %v2426_v38  ;;  %v3382_v53 = vpop.eup %3381  ;;  %v2416_v30 = vadd.f32 1.0, %v3380_v48 }
 0x79f   :  { %3145 = vmatprep.subr.bf16.mxu1 %v3144_v63  ;;  %v2429_v1 = vadd.f32 %v2427_v0, %v2425_v51  ;;  %v2415_v54 = vadd.f32 1.0, %v3382_v53  ;;  %v2435_v53 = vld [vmem:[%s4206_s6] sm:$0x1]  ;;  %s3425_s6 = scalar_lea.vmem %s2533_s9, 16 }
 0x7a0   :  { %3147 = vmatpush3.bf16.msra.mxu1 %v3144_v63  ;;  %3383 = vtanh.f32 %v2430_v29  ;;  %v2422_v11 = vmul.f32 0.5, %v2416_v30  ;;  %v2442_v30 = vlaneseq  ;;  %p3426_p0 = scmp.ne.s32.totalorder %s2533_s9, %s3425_s6  ;;  %p3431_p2 = scmp.lt.s32.totalorder %s3429_s10, %s3425_s6 }
 0x7a1   :  { %3077 = vmatprep.subr.mxu1 %v3970_v4  ;;  %3385 = vtanh.f32 %v2429_v1  ;;  %v2421_v52 = vmul.f32 0.5, %v2415_v54 }
 0x7a2   :  { %v2443_v54 = vshrl.u32 %v2442_v30, 7  ;;  %p3432_p3 = por %p3431_p2, %p3430_p1 }
 0x7a3   :  { %3066 = vmatmul.mubr.msk.f32.vlgmr.msra.gmra.mrb[26].mxu1 %vm110_vm1, %v3975_v14 }
 0x7a4   :  { %3068 = vmatprep.mubr.msk.f32.mxu1 %vm110_vm1, %v3982_v15  ;;  %3078 = vmatpush3.msra.mxu1 %v3970_v4  ;;  %p3433_p4 = pnand %p3432_p3, %p3426_p0 }
 0x7a7   :  { %3069 = vmatmul.mubr.msk.f32.gmra.mrb[28].mxu1 %vm110_vm1, %v3990_v16 }
 0x7a8   :  { %3071 = vmatprep.mubr.msk.f32.mxu1 %vm110_vm1, %v3997_v19  ;;  %v3451_v19 = vmov 0.0|0.0  }
 0x7a9   :  { %3148 = vmatprep.subr.bf16.mxu1 %v3451_v19 }
 0x7aa   :  { %v3384_v55 = vpop.eup %3383 }
 0x7ab   :  { %3072 = vmatmul.mubr.msk.f32.gmra.mrb[30].mxu1 %vm110_vm1, %v4004_v20  ;;  %v3386_v14 = vpop.eup %3385  ;;  %v4141_v15 = vmul.f32 %v3384_v55, %v2422_v11  ;;  %v2444_v11 = vsub.s32 0, %v2443_v54  ;;  %v2440_v55 = vpop.permute.xlu0 %2439 }
 0x7ac   :  { %3074 = vmatprep.mubr.msk.f32.mxu1 %vm110_vm1, %v4011_v23  ;;  %v4143_v4 = vmul.f32 %v3386_v14, %v2421_v52 }
 0x7ad   :  { %v2445_v52 = vrot.slane %v2440_v55, %v2444_v11 }
 0x7ae   :  { %v3152_v16 = vpack.c.bf16 %v4141_v15, %v4143_v4 }
 0x7af   :  { %3075 = vmatmul.mubr.msk.f32.gmra.mrb[32].mxu1 %vm110_vm1, %v4018_v24 }
 0x7b0   :  { %3079 = vmatprep.mubr.msk.f32.mxu1 %vm36_vm0, %v4025_v27 }
 0x7b3   :  { %3080 = vmatmul.mubr.msk.f32.vlgmr.msra.gmra.mrb[26].mxu1 %vm36_vm0, %v4032_v28 }
 0x7b4   :  { %3082 = vmatprep.mubr.msk.f32.mxu1 %vm36_vm0, %v4039_v31 }
 0x7b7   :  { %3083 = vmatmul.mubr.msk.f32.gmra.mrb[28].mxu1 %vm36_vm0, %v4047_v32 }
 0x7b8   :  { %3085 = vmatprep.mubr.msk.f32.mxu1 %vm36_vm0, %v4054_v35 }
 0x7bb   :  { %3086 = vmatmul.mubr.msk.f32.gmra.mrb[30].mxu1 %vm36_vm0, %v4061_v36 }
 0x7bc   :  { %3088 = vmatprep.mubr.msk.f32.mxu1 %vm36_vm0, %v4068_v39 }
 0x7bf   :  { %3089 = vmatmul.mubr.msk.f32.gmra.mrb[32].mxu1 %vm36_vm0, %v4078_v50 }
 0x7c0   :  { %3113 = vmatprep.mubr.msk.f32.mxu1 %vm3452_vm2, %v3449_v2 }
 0x886   :  { %v3081_v20 = vpop.f32.mrb[26].mxu1 }
 0x887   :  { %v2163_v23 = vadd.f32 %v3081_v20, %v3681_v44  ;;  %v2123_v24 = vpop.f32.mrb[27].mxu1 }
 0x888   :  { %v2162_v27 = vadd.f32 %v2123_v24, %v3677_v42 }
 0x889   :  { %v2171_v28 = vmul.f32 0.5, %v2163_v23 }
 0x88a   :  { %v2170_v31 = vmul.f32 0.5, %v2162_v27  ;;  %v3084_v32 = vpop.f32.mrb[28].mxu1 }
 0x88b   :  { %v2165_v35 = vadd.f32 %v3084_v32, %v3685_v49  ;;  %v2133_v36 = vpop.f32.mrb[29].mxu1  ;;  %3387 = vtanh.f32 %v2171_v28 }
 0x88c   :  { %v2164_v39 = vadd.f32 %v2133_v36, %v3679_v43  ;;  %3389 = vtanh.f32 %v2170_v31 }
 0x88d   :  { %v2173_v50 = vmul.f32 0.5, %v2165_v35 }
 0x88e   :  { %v2172_v56 = vmul.f32 0.5, %v2164_v39  ;;  %v3087_v12 = vpop.f32.mrb[30].mxu1 }
 0x88f   :  { %3391 = vtanh.f32 %v2173_v50  ;;  %v2143_v2 = vpop.f32.mrb[31].mxu1  ;;  %v2167_v58 = vadd.f32 %v3087_v12, %v3693_v5 }
 0x890   :  { %3393 = vtanh.f32 %v2172_v56  ;;  %v2166_v49 = vadd.f32 %v2143_v2, %v3696_v7 }
 0x891   :  { %v2175_v3 = vmul.f32 0.5, %v2167_v58 }
 0x892   :  { %v3090_v44 = vpop.f32.mrb[32].mxu1  ;;  %v2174_v8 = vmul.f32 0.5, %v2166_v49 }
 0x893   :  { %v2169_v57 = vadd.f32 %v3090_v44, %v3689_v59  ;;  %v2153_v42 = vpop.f32.mrb[33].mxu1 }
 0x894   :  { %v2168_v60 = vadd.f32 %v2153_v42, %v3691_v61 }
 0x895   :  { %3395 = vtanh.f32 %v2169_v57  ;;  %v3388_v43 = vpop.eup %3387 }
 0x896   :  { %3397 = vtanh.f32 %v2168_v60  ;;  %v3390_v62 = vpop.eup %3389  ;;  %v2183_v10 = vadd.f32 1.0, %v3388_v43 }
 0x897   :  { %v2182_v17 = vadd.f32 1.0, %v3390_v62  ;;  %3399 = vtanh.f32 %v2175_v3 }
 0x898   :  { %3401 = vtanh.f32 %v2174_v8  ;;  %v2189_v5 = vmul.f32 0.5, %v2183_v10 }
 0x899   :  { %v3392_v6 = vpop.eup %3391  ;;  %v2188_v21 = vmul.f32 0.5, %v2182_v17 }
 0x89a   :  { %v3394_v9 = vpop.eup %3393  ;;  %v2185_v13 = vadd.f32 1.0, %v3392_v6 }
 0x89b   :  { %v2184_v40 = vadd.f32 1.0, %v3394_v9 }
 0x89c   :  { %v2191_v59 = vmul.f32 0.5, %v2185_v13 }
 0x89d   :  { %v2190_v18 = vmul.f32 0.5, %v2184_v40 }
 0x89e   :  { %v2197_v41 = vmul.f32 %v2191_v59, %v4121_v46 }
 0x89f   :  { %v3396_v61 = vpop.eup %3395  ;;  %v2196_v25 = vmul.f32 %v2190_v18, %v4123_v47 }
 0x8a0   :  { %v3398_v7 = vpop.eup %3397  ;;  %v2199_v22 = vmul.f32 %v3396_v61, %v2189_v5 }
 0x8a1   :  { %v2198_v26 = vmul.f32 %v3398_v7, %v2188_v21  ;;  %v3400_v37 = vpop.eup %3399 }
 0x8a2   :  { %v2201_v33 = vadd.f32 %v2199_v22, %v2197_v41  ;;  %v3402_v38 = vpop.eup %3401  ;;  %v2187_v45 = vadd.f32 1.0, %v3400_v37 }
 0x8a3   :  { %v2200_v34 = vadd.f32 %v2198_v26, %v2196_v25  ;;  %v2186_v63 = vadd.f32 1.0, %v3402_v38 }
 0x8a4   :  { %3403 = vtanh.f32 %v2201_v33  ;;  %2209 = vst.msk [vmem:[#allocation3 + $0x8] sm:$0xff] %vm36_vm0, %v2201_v33  ;;  %v2193_v51 = vmul.f32 0.5, %v2187_v45 }
 0x8a5   :  { %3405 = vtanh.f32 %v2200_v34  ;;  %2208 = vst.msk [vmem:[#allocation3] sm:$0xff] %vm36_vm0, %v2200_v34  ;;  %v2192_v29 = vmul.f32 0.5, %v2186_v63 }
 0x8ae   :  { %v3404_v0 = vpop.eup %3403 }
 0x8af   :  { %v3406_v46 = vpop.eup %3405  ;;  %v2205_v1 = vmul.f32 %v3404_v0, %v2193_v51 }
 0x8b0   :  { %v2204_v48 = vmul.f32 %v3406_v46, %v2192_v29 }
 0x8b1   :  { %2207 = vst.msk [vmem:[#allocation2 + $0x8] sm:$0xff] %vm36_vm0, %v2205_v1 }
 0x8b2   :  { %2206 = vst.msk [vmem:[#allocation2] sm:$0xff] %vm36_vm0, %v2204_v48  ;;  %v3149_v47 = vpack.c.bf16 %v2205_v1, %v2204_v48 }
 0x8b4   :  { %3150 = vmatpush3.bf16.msra.mxu1 %v3149_v47 }
 0x8b5   :  { %3151 = vmatprep.subr.bf16.mxu1 %v3451_v19 }
 0x8b8   :  { %3153 = vmatpush3.bf16.msra.mxu1 %v3152_v16 }
 0x8bb   :  { %3114 = vmatmul.mubr.msk.f32.vlgmr.msra.gmra.mrb[34].mxu1 %vm2446_vm3, %v2435_v53 }
 0x98e   :  { %v2516_v14 = vpop.f32.mrb[34].mxu1 }
 0x98f   :  { %v2517_v20 = vadd.f32 %v2516_v14, %v2445_v52  ;;  %v3115_v23 = vpop.f32.mrb[35].mxu1 }
 0x991   :  { %v2520_v24 = vmul.f32 0.5, %v2517_v20 }
 0x993   :  { %3407 = vtanh.f32 %v2520_v24 }
 0x99d   :  { %v3408_v19 = vpop.eup %3407 }
 0x99e   :  { %v2522_v15 = vadd.f32 1.0, %v3408_v19 }
 0x9a0   :  { %v2523_v4 = vmul.f32 0.5, %v2522_v15 }
 0x9a2   :  { %2525 = vst.msk [vmem:[#allocation5] sm:$0x1] %vm2524_vm4, %v2523_v4 }
 0x9a3   :  { %3436 = shalt.err (!%p3433_p4)
}
 0x9a4   :  { %s3437_s13 = scalar_lea.hbm %s4208_s8, 16 }
 0x9a5   :  { %p3438_p5 = scmp.ne.s32.totalorder %s4208_s8, %s3437_s13  ;;  %p3441_p6 = scmp.lt.u32.totalorder %s3437_s13, %s4208_s8 }
 0x9a7   :  { %p3443_p7 = pnand %p3441_p6, %p3438_p5 }
 0x9a9   :  { %3446 = shalt.err (!%p3443_p7)
}
 0x9aa   :  { %2535 = dma.vmem_to_hbm [thread:$0]  %s2533_s9, 16, %s4208_s8, [#allocation6]  }
 0x9ab   :  { %3447 = dma.done.wait [#allocation6], 16  }
 0x9ac   :  { %3448 = vsyncadd [#allocation6], 4294967280 }
 0x9ad   :  { %2539 = vsyncpa [#allocation6], 1 }

</bundles_post_ra>
